<compile_context>
chip_gen: v7x
topology: tpu7x:2x2x1
jax: 0.10.0
libtpu: 0.0.40
codegen_flags: <defaults>
</compile_context>

<pallas_src>
import functools
import math

import jax
import jax.numpy as jnp
from jax.experimental import pallas as pl
from jax.experimental.pallas import tpu as pltpu


# ------------------------------ configuration ------------------------------
CONFIG = dict(
    vocab_size=100,
    hidden=32,
    n_heads=2,
    head_dim=16,        # hidden // n_heads
    intermediate=64,
    n_layers=2,
    max_pos=16,
    type_vocab=2,
    n_class=3,
)


# ------------------------------ fused Pallas kernel ------------------------

def _bert_fused_kernel(emb_ref, mask_ref, w_ref, v_ref, head_ref, out_ref,
                       *, n_layers, n_heads, head_dim, intermediate, n_class,
                       eps):
  """One sequence per grid step; all weights VMEM-resident across the grid."""
  H = n_heads * head_dim
  I = intermediate
  scale = jnp.float32(1.0 / math.sqrt(head_dim))

  def layer_norm(x, g, b):
    mean = jnp.mean(x, axis=-1, keepdims=True)
    c = x - mean
    var = jnp.mean(c * c, axis=-1, keepdims=True)
    return c * jax.lax.rsqrt(var + eps) * g + b

  def gelu(y):
    # TODO(synk): HF BERT default is erf-based GELU; tanh approximation used
    # here (erf has no guaranteed Mosaic lowering).
    c = jnp.float32(math.sqrt(2.0 / math.pi))
    return 0.5 * y * (1.0 + jnp.tanh(c * (y + 0.044715 * y * y * y)))

  # Additive key bias generated in-kernel from the (1, S) padding mask --
  # nothing O(S^2) is ever materialized in HBM/VMEM as an input.
  key_bias = (1.0 - mask_ref[0]) * jnp.float32(-10000.0)        # (1, S)

  # Embedding LayerNorm (embedding dropout is identity at inference).
  h = layer_norm(emb_ref[0],
                 head_ref[2 * H:2 * H + 1, :],
                 head_ref[2 * H + 1:2 * H + 2, :])              # (S, H)

  for l in range(n_layers):                 # static unroll; weights resident
    qkv_w = w_ref[l, 0:H, 0:3 * H]          # (H, 3H)
    ao_w = w_ref[l, 0:H, 3 * H:4 * H]       # (H, H)
    ff1_w = w_ref[l, 0:H, 4 * H:4 * H + I]  # (H, I)
    ff2_w = w_ref[l, H:H + I, 0:H]          # (I, H)
    qkv_b = v_ref[l, 0:1, 0:3 * H]
    ao_b = v_ref[l, 1:2, 0:H]
    ln1_g = v_ref[l, 2:3, 0:H]
    ln1_b = v_ref[l, 3:4, 0:H]
    ff1_b = v_ref[l, 4:5, 0:I]
    ff2_b = v_ref[l, 5:6, 0:H]
    ln2_g = v_ref[l, 6:7, 0:H]
    ln2_b = v_ref[l, 7:8, 0:H]

    # Fused QKV projection; result stays in vregs (no scratch write).
    qkv = jnp.dot(h, qkv_w, preferred_element_type=jnp.float32) + qkv_b

    # Self-attention per head on lane slices of the QKV value.
    # TODO(synk): at larger head counts, batch heads via a single
    # einsum('hqd,hkd->hqk') / ('hqk,hkd->hqd') pair instead of this loop.
    ctx_heads = []
    for hd in range(n_heads):
      lo, hi = hd * head_dim, (hd + 1) * head_dim
      q_h = qkv[:, lo:hi]                       # (S, Dh)
      k_h = qkv[:, H + lo:H + hi]               # (S, Dh)
      v_h = qkv[:, 2 * H + lo:2 * H + hi]       # (S, Dh)
      # Contract K's feature dim directly: no explicit XLU transpose.
      s = jax.lax.dot_general(q_h, k_h, (((1,), (1,)), ((), ())),
                              preferred_element_type=jnp.float32) * scale
      s = s + key_bias
      s = s - jnp.max(s, axis=-1, keepdims=True)
      p = jnp.exp(s)
      p = p / jnp.sum(p, axis=-1, keepdims=True)          # exact softmax
      ctx_heads.append(jnp.dot(p, v_h, preferred_element_type=jnp.float32))
    ctx = jnp.concatenate(ctx_heads, axis=-1)             # (S, H), in vregs

    # Attention output projection + residual + LayerNorm.
    attn_out = jnp.dot(ctx, ao_w, preferred_element_type=jnp.float32) + ao_b
    h = layer_norm(attn_out + h, ln1_g, ln1_b)

    # FFN: dense -> gelu -> dense -> residual + LayerNorm.
    ffn = gelu(jnp.dot(h, ff1_w, preferred_element_type=jnp.float32) + ff1_b)
    ffn = jnp.dot(ffn, ff2_w, preferred_element_type=jnp.float32) + ff2_b
    h = layer_norm(ffn + h, ln2_g, ln2_b)

  # Pooler (tanh dense) + classifier, applied only to this sequence's CLS row.
  # Classifier nn.Dropout(0.5) is identity at eval.
  cls_row = h[0:1, :]                                     # (1, H)
  pooler_w = head_ref[0:H, :]
  pooler_b = head_ref[2 * H + 2:2 * H + 3, :]
  cls_w = head_ref[H:2 * H, 0:n_class]
  cls_b = head_ref[2 * H + 3:2 * H + 4, 0:n_class]
  pooled = jnp.tanh(
      jnp.dot(cls_row, pooler_w, preferred_element_type=jnp.float32)
      + pooler_b)
  logits = jnp.dot(pooled, cls_w, preferred_element_type=jnp.float32) + cls_b
  out_ref[0, :, :] = logits                               # (1, C)


# --------------------------- parameter initialization -----------------------

def init_params(key):
  cfg = CONFIG
  H, I, C = cfg["hidden"], cfg["intermediate"], cfg["n_class"]

  def nrm(k, shape):
    return 0.02 * jax.random.normal(k, shape, dtype=jnp.float32)

  keys = jax.random.split(key, 5 + cfg["n_layers"])
  params = {
      "word_emb": nrm(keys[0], (cfg["vocab_size"], H)),
      "pos_emb": nrm(keys[1], (cfg["max_pos"], H)),
      "type_emb": nrm(keys[2], (cfg["type_vocab"], H)),
      "emb_ln_g": jnp.ones((H,), jnp.float32),
      "emb_ln_b": jnp.zeros((H,), jnp.float32),
      "pooler_w": nrm(keys[3], (H, H)),
      "pooler_b": jnp.zeros((H,), jnp.float32),
      "cls_w": nrm(keys[4], (H, C)),
      "cls_b": jnp.zeros((C,), jnp.float32),
      "layers": [],
  }
  for l in range(cfg["n_layers"]):
    lk = jax.random.split(keys[5 + l], 6)
    params["layers"].append({
        "q_w": nrm(lk[0], (H, H)), "q_b": jnp.zeros((H,), jnp.float32),
        "k_w": nrm(lk[1], (H, H)), "k_b": jnp.zeros((H,), jnp.float32),
        "v_w": nrm(lk[2], (H, H)), "v_b": jnp.zeros((H,), jnp.float32),
        "ao_w": nrm(lk[3], (H, H)), "ao_b": jnp.zeros((H,), jnp.float32),
        "ln1_g": jnp.ones((H,), jnp.float32),
        "ln1_b": jnp.zeros((H,), jnp.float32),
        "ff1_w": nrm(lk[4], (H, I)), "ff1_b": jnp.zeros((I,), jnp.float32),
        "ff2_w": nrm(lk[5], (I, H)), "ff2_b": jnp.zeros((H,), jnp.float32),
        "ln2_g": jnp.ones((H,), jnp.float32),
        "ln2_b": jnp.zeros((H,), jnp.float32),
    })
  return params


def pack_params(params):
  """One-time packing of all per-layer / head weights into 3 VMEM slabs."""
  cfg = CONFIG
  H, I, C, L = cfg["hidden"], cfg["intermediate"], cfg["n_class"], cfg["n_layers"]
  w_cols = 3 * H + H + I                       # qkv | ao | ff1 columns
  w_slab = jnp.zeros((L, H + I, w_cols), jnp.float32)
  v_slab = jnp.zeros((L, 8, 3 * H), jnp.float32)
  for l, lp in enumerate(params["layers"]):
    qkv_w = jnp.concatenate([lp["q_w"], lp["k_w"], lp["v_w"]], axis=1)
    qkv_b = jnp.concatenate([lp["q_b"], lp["k_b"], lp["v_b"]])
    w_slab = w_slab.at[l, :H, 0:3 * H].set(qkv_w)
    w_slab = w_slab.at[l, :H, 3 * H:4 * H].set(lp["ao_w"])
    w_slab = w_slab.at[l, :H, 4 * H:4 * H + I].set(lp["ff1_w"])
    w_slab = w_slab.at[l, H:H + I, 0:H].set(lp["ff2_w"])
    v_slab = v_slab.at[l, 0, 0:3 * H].set(qkv_b)
    v_slab = v_slab.at[l, 1, 0:H].set(lp["ao_b"])
    v_slab = v_slab.at[l, 2, 0:H].set(lp["ln1_g"])
    v_slab = v_slab.at[l, 3, 0:H].set(lp["ln1_b"])
    v_slab = v_slab.at[l, 4, 0:I].set(lp["ff1_b"])
    v_slab = v_slab.at[l, 5, 0:H].set(lp["ff2_b"])
    v_slab = v_slab.at[l, 6, 0:H].set(lp["ln2_g"])
    v_slab = v_slab.at[l, 7, 0:H].set(lp["ln2_b"])
  head = jnp.zeros((2 * H + 4, H), jnp.float32)
  head = head.at[0:H, :].set(params["pooler_w"])
  head = head.at[H:2 * H, 0:C].set(params["cls_w"])
  head = head.at[2 * H, :].set(params["emb_ln_g"])
  head = head.at[2 * H + 1, :].set(params["emb_ln_b"])
  head = head.at[2 * H + 2, :].set(params["pooler_b"])
  head = head.at[2 * H + 3, 0:C].set(params["cls_b"])
  return dict(w_slab=w_slab, v_slab=v_slab, head_slab=head,
              word_emb=params["word_emb"], pos_emb=params["pos_emb"],
              type_emb=params["type_emb"])


# --------------------------------- forward ----------------------------------

def bert_classify_forward(packed, input_ids, token_type_ids, attention_mask):
  cfg = CONFIG
  B, S = input_ids.shape
  H, nH, Dh = cfg["hidden"], cfg["n_heads"], cfg["head_dim"]
  L, C, I = cfg["n_layers"], cfg["n_class"], cfg["intermediate"]

  # Embedding gathers are XLA glue; everything else runs in one fused kernel.
  pos_ids = jnp.arange(S)
  emb = (jnp.take(packed["word_emb"], input_ids, axis=0)
         + jnp.take(packed["pos_emb"], pos_ids, axis=0)[None, :, :]
         + jnp.take(packed["type_emb"], token_type_ids, axis=0))
  emb = emb.astype(jnp.float32)                          # (B, S, H)
  mask = attention_mask.astype(jnp.float32).reshape(B, 1, S)

  kernel = functools.partial(
      _bert_fused_kernel, n_layers=L, n_heads=nH, head_dim=Dh,
      intermediate=I, n_class=C, eps=1e-12)

  out = pl.pallas_call(
      kernel,
      out_shape=jax.ShapeDtypeStruct((B, 1, C), jnp.float32),
      grid=(B,),
      in_specs=[
          pl.BlockSpec((1, S, H), lambda b: (b, 0, 0)),            # emb
          pl.BlockSpec((1, 1, S), lambda b: (b, 0, 0)),            # pad mask
          pl.BlockSpec(packed["w_slab"].shape, lambda b: (0, 0, 0)),
          pl.BlockSpec(packed["v_slab"].shape, lambda b: (0, 0, 0)),
          pl.BlockSpec(packed["head_slab"].shape, lambda b: (0, 0)),
      ],
      out_specs=pl.BlockSpec((1, 1, C), lambda b: (b, 0, 0)),
      compiler_params=pltpu.CompilerParams(
          dimension_semantics=("parallel",)),
  )(emb, mask, packed["w_slab"], packed["v_slab"], packed["head_slab"])

  return out.reshape(B, C)                               # (B, n_class) logits


# ----------------------------------- main ------------------------------------

if __name__ == "__main__":
  key = jax.random.PRNGKey(0)
  pkey, dkey = jax.random.split(key)
  packed = pack_params(init_params(pkey))                # one-time packing

  B, S = 2, 8
  input_ids = jax.random.randint(dkey, (B, S), 0, CONFIG["vocab_size"],
                                 dtype=jnp.int32)
  token_type_ids = jnp.zeros((B, S), dtype=jnp.int32)
  attention_mask = jnp.ones((B, S), dtype=jnp.int32)

  logits = jax.jit(bert_classify_forward)(packed, input_ids,
                                          token_type_ids, attention_mask)
  jax.block_until_ready(logits)
  assert logits.shape == (B, CONFIG["n_class"])
  print("KERNEL_OK")
</pallas_src>

<mosaic_0001>
module attributes {stable_mosaic.version = 11 : i64} {
  func.func @_bert_fused_kernel(%arg0: i32, %arg1: memref<1x8x32xf32, #tpu.memory_space<vmem>>, %arg2: memref<1x1x8xf32, #tpu.memory_space<vmem>>, %arg3: memref<2x96x192xf32, #tpu.memory_space<vmem>>, %arg4: memref<2x8x96xf32, #tpu.memory_space<vmem>>, %arg5: memref<68x32xf32, #tpu.memory_space<vmem>>, %arg6: memref<1x1x3xf32, #tpu.memory_space<vmem>>) attributes {dimension_semantics = [#tpu.dimension_semantics<parallel>], iteration_bounds = array<i64: 2>, scalar_prefetch = 0 : i64, scratch_operands = 0 : i64, tpu.core_type = #tpu.core_type<tc>, window_params = [{transform_indices = @transform_0, window_bounds = array<i64: 1, 8, 32>}, {transform_indices = @transform_1, window_bounds = array<i64: 1, 1, 8>}, {pipeline_mode = #tpu.pipeline_mode<synchronous>, transform_indices = @transform_2, window_bounds = array<i64: 2, 96, 192>}, {pipeline_mode = #tpu.pipeline_mode<synchronous>, transform_indices = @transform_3, window_bounds = array<i64: 2, 8, 96>}, {pipeline_mode = #tpu.pipeline_mode<synchronous>, transform_indices = @transform_4, window_bounds = array<i64: 68, 32>}, {transform_indices = @transform_5, window_bounds = array<i64: 1, 1, 3>}]} {
    %c0 = arith.constant 0 : index
    %c0_0 = arith.constant 0 : index
    %c0_1 = arith.constant 0 : index
    %0 = vector.load %arg2[%c0, %c0_0, %c0_1] : memref<1x1x8xf32, #tpu.memory_space<vmem>>, vector<1x1x8xf32>
    %1 = vector.shape_cast %0 : vector<1x1x8xf32> to vector<1x8xf32>
    %cst = arith.constant 1.000000e+00 : f32
    %2 = vector.broadcast %cst : f32 to vector<1x8xf32>
    %3 = arith.subf %2, %1 : vector<1x8xf32>
    %cst_2 = arith.constant -1.000000e+04 : f32
    %4 = vector.broadcast %cst_2 : f32 to vector<1x8xf32>
    %5 = arith.mulf %3, %4 : vector<1x8xf32>
    %c0_3 = arith.constant 0 : index
    %c0_4 = arith.constant 0 : index
    %c0_5 = arith.constant 0 : index
    %6 = vector.load %arg1[%c0_3, %c0_4, %c0_5] : memref<1x8x32xf32, #tpu.memory_space<vmem>>, vector<1x8x32xf32>
    %7 = vector.shape_cast %6 : vector<1x8x32xf32> to vector<8x32xf32>
    %c64 = arith.constant 64 : index
    %c0_6 = arith.constant 0 : index
    %8 = vector.load %arg5[%c64, %c0_6] : memref<68x32xf32, #tpu.memory_space<vmem>>, vector<1x32xf32>
    %c65 = arith.constant 65 : index
    %c0_7 = arith.constant 0 : index
    %9 = vector.load %arg5[%c65, %c0_7] : memref<68x32xf32, #tpu.memory_space<vmem>>, vector<1x32xf32>
    %cst_8 = arith.constant dense<0.000000e+00> : vector<8xf32>
    %10 = vector.multi_reduction <add>, %7, %cst_8 [1] : vector<8x32xf32> to vector<8xf32>
    %11 = vector.shape_cast %10 : vector<8xf32> to vector<8x1xf32>
    %cst_9 = arith.constant 3.200000e+01 : f32
    %12 = vector.broadcast %cst_9 : f32 to vector<8x1xf32>
    %13 = arith.divf %11, %12 : vector<8x1xf32>
    %14 = vector.broadcast %13 : vector<8x1xf32> to vector<8x32xf32>
    %15 = arith.subf %7, %14 : vector<8x32xf32>
    %16 = arith.mulf %15, %15 : vector<8x32xf32>
    %cst_10 = arith.constant dense<0.000000e+00> : vector<8xf32>
    %17 = vector.multi_reduction <add>, %16, %cst_10 [1] : vector<8x32xf32> to vector<8xf32>
    %18 = vector.shape_cast %17 : vector<8xf32> to vector<8x1xf32>
    %cst_11 = arith.constant 3.200000e+01 : f32
    %19 = vector.broadcast %cst_11 : f32 to vector<8x1xf32>
    %20 = arith.divf %18, %19 : vector<8x1xf32>
    %cst_12 = arith.constant 9.99999996E-13 : f32
    %21 = vector.broadcast %cst_12 : f32 to vector<8x1xf32>
    %22 = arith.addf %20, %21 : vector<8x1xf32>
    %23 = math.rsqrt %22 : vector<8x1xf32>
    %24 = vector.broadcast %23 : vector<8x1xf32> to vector<8x32xf32>
    %25 = arith.mulf %15, %24 : vector<8x32xf32>
    %26 = vector.broadcast %8 : vector<1x32xf32> to vector<8x32xf32>
    %27 = arith.mulf %25, %26 : vector<8x32xf32>
    %28 = vector.broadcast %9 : vector<1x32xf32> to vector<8x32xf32>
    %29 = arith.addf %27, %28 : vector<8x32xf32>
    %c0_13 = arith.constant 0 : index
    %c0_14 = arith.constant 0 : index
    %c0_15 = arith.constant 0 : index
    %30 = vector.load %arg3[%c0_13, %c0_14, %c0_15] : memref<2x96x192xf32, #tpu.memory_space<vmem>>, vector<1x32x96xf32>
    %31 = vector.shape_cast %30 : vector<1x32x96xf32> to vector<32x96xf32>
    %c0_16 = arith.constant 0 : index
    %c0_17 = arith.constant 0 : index
    %c96 = arith.constant 96 : index
    %32 = vector.load %arg3[%c0_16, %c0_17, %c96] : memref<2x96x192xf32, #tpu.memory_space<vmem>>, vector<1x32x32xf32>
    %33 = vector.shape_cast %32 : vector<1x32x32xf32> to vector<32x32xf32>
    %c0_18 = arith.constant 0 : index
    %c0_19 = arith.constant 0 : index
    %c128 = arith.constant 128 : index
    %34 = vector.load %arg3[%c0_18, %c0_19, %c128] : memref<2x96x192xf32, #tpu.memory_space<vmem>>, vector<1x32x64xf32>
    %35 = vector.shape_cast %34 : vector<1x32x64xf32> to vector<32x64xf32>
    %c0_20 = arith.constant 0 : index
    %c32 = arith.constant 32 : index
    %c0_21 = arith.constant 0 : index
    %36 = vector.load %arg3[%c0_20, %c32, %c0_21] : memref<2x96x192xf32, #tpu.memory_space<vmem>>, vector<1x64x32xf32>
    %37 = vector.shape_cast %36 : vector<1x64x32xf32> to vector<64x32xf32>
    %c0_22 = arith.constant 0 : index
    %c0_23 = arith.constant 0 : index
    %c0_24 = arith.constant 0 : index
    %38 = vector.load %arg4[%c0_22, %c0_23, %c0_24] : memref<2x8x96xf32, #tpu.memory_space<vmem>>, vector<1x1x96xf32>
    %39 = vector.shape_cast %38 : vector<1x1x96xf32> to vector<1x96xf32>
    %c0_25 = arith.constant 0 : index
    %c1 = arith.constant 1 : index
    %c0_26 = arith.constant 0 : index
    %40 = vector.load %arg4[%c0_25, %c1, %c0_26] : memref<2x8x96xf32, #tpu.memory_space<vmem>>, vector<1x1x32xf32>
    %41 = vector.shape_cast %40 : vector<1x1x32xf32> to vector<1x32xf32>
    %c0_27 = arith.constant 0 : index
    %c2 = arith.constant 2 : index
    %c0_28 = arith.constant 0 : index
    %42 = vector.load %arg4[%c0_27, %c2, %c0_28] : memref<2x8x96xf32, #tpu.memory_space<vmem>>, vector<1x1x32xf32>
    %43 = vector.shape_cast %42 : vector<1x1x32xf32> to vector<1x32xf32>
    %c0_29 = arith.constant 0 : index
    %c3 = arith.constant 3 : index
    %c0_30 = arith.constant 0 : index
    %44 = vector.load %arg4[%c0_29, %c3, %c0_30] : memref<2x8x96xf32, #tpu.memory_space<vmem>>, vector<1x1x32xf32>
    %45 = vector.shape_cast %44 : vector<1x1x32xf32> to vector<1x32xf32>
    %c0_31 = arith.constant 0 : index
    %c4 = arith.constant 4 : index
    %c0_32 = arith.constant 0 : index
    %46 = vector.load %arg4[%c0_31, %c4, %c0_32] : memref<2x8x96xf32, #tpu.memory_space<vmem>>, vector<1x1x64xf32>
    %47 = vector.shape_cast %46 : vector<1x1x64xf32> to vector<1x64xf32>
    %c0_33 = arith.constant 0 : index
    %c5 = arith.constant 5 : index
    %c0_34 = arith.constant 0 : index
    %48 = vector.load %arg4[%c0_33, %c5, %c0_34] : memref<2x8x96xf32, #tpu.memory_space<vmem>>, vector<1x1x32xf32>
    %49 = vector.shape_cast %48 : vector<1x1x32xf32> to vector<1x32xf32>
    %c0_35 = arith.constant 0 : index
    %c6 = arith.constant 6 : index
    %c0_36 = arith.constant 0 : index
    %50 = vector.load %arg4[%c0_35, %c6, %c0_36] : memref<2x8x96xf32, #tpu.memory_space<vmem>>, vector<1x1x32xf32>
    %51 = vector.shape_cast %50 : vector<1x1x32xf32> to vector<1x32xf32>
    %c0_37 = arith.constant 0 : index
    %c7 = arith.constant 7 : index
    %c0_38 = arith.constant 0 : index
    %52 = vector.load %arg4[%c0_37, %c7, %c0_38] : memref<2x8x96xf32, #tpu.memory_space<vmem>>, vector<1x1x32xf32>
    %53 = vector.shape_cast %52 : vector<1x1x32xf32> to vector<1x32xf32>
    %cst_39 = arith.constant dense<0.000000e+00> : vector<8x96xf32>
    %54 = tpu.matmul %29, %31, %cst_39 {dimension_numbers = #tpu.dot_dimension_numbers<[1], [0], [0], [1], [0, 0, 1, 1], [], []>} : vector<8x32xf32>, vector<32x96xf32>, vector<8x96xf32> -> vector<8x96xf32>
    %55 = vector.broadcast %39 : vector<1x96xf32> to vector<8x96xf32>
    %56 = arith.addf %54, %55 : vector<8x96xf32>
    %57 = vector.extract_strided_slice %56 {offsets = [0, 0], sizes = [8, 16], strides = [1, 1]} : vector<8x96xf32> to vector<8x16xf32>
    %58 = vector.extract_strided_slice %56 {offsets = [0, 32], sizes = [8, 16], strides = [1, 1]} : vector<8x96xf32> to vector<8x16xf32>
    %59 = vector.extract_strided_slice %56 {offsets = [0, 64], sizes = [8, 16], strides = [1, 1]} : vector<8x96xf32> to vector<8x16xf32>
    %cst_40 = arith.constant dense<0.000000e+00> : vector<8x8xf32>
    %60 = tpu.matmul %57, %58, %cst_40 {dimension_numbers = #tpu.dot_dimension_numbers<[1], [1], [0], [0], [0, 0, 1, 0], [], []>} : vector<8x16xf32>, vector<8x16xf32>, vector<8x8xf32> -> vector<8x8xf32>
    %cst_41 = arith.constant 2.500000e-01 : f32
    %61 = vector.broadcast %cst_41 : f32 to vector<8x8xf32>
    %62 = arith.mulf %60, %61 : vector<8x8xf32>
    %63 = vector.broadcast %5 : vector<1x8xf32> to vector<8x8xf32>
    %64 = arith.addf %62, %63 : vector<8x8xf32>
    %cst_42 = arith.constant dense<0xFF800000> : vector<8xf32>
    %65 = vector.multi_reduction <maximumf>, %64, %cst_42 [1] : vector<8x8xf32> to vector<8xf32>
    %66 = vector.shape_cast %65 : vector<8xf32> to vector<8x1xf32>
    %67 = vector.broadcast %66 : vector<8x1xf32> to vector<8x8xf32>
    %68 = arith.subf %64, %67 : vector<8x8xf32>
    %69 = math.exp %68 : vector<8x8xf32>
    %cst_43 = arith.constant dense<0.000000e+00> : vector<8xf32>
    %70 = vector.multi_reduction <add>, %69, %cst_43 [1] : vector<8x8xf32> to vector<8xf32>
    %71 = vector.shape_cast %70 : vector<8xf32> to vector<8x1xf32>
    %72 = vector.broadcast %71 : vector<8x1xf32> to vector<8x8xf32>
    %73 = arith.divf %69, %72 : vector<8x8xf32>
    %cst_44 = arith.constant dense<0.000000e+00> : vector<8x16xf32>
    %74 = tpu.matmul %73, %59, %cst_44 {dimension_numbers = #tpu.dot_dimension_numbers<[1], [0], [0], [1], [0, 0, 1, 1], [], []>} : vector<8x8xf32>, vector<8x16xf32>, vector<8x16xf32> -> vector<8x16xf32>
    %75 = vector.extract_strided_slice %56 {offsets = [0, 16], sizes = [8, 16], strides = [1, 1]} : vector<8x96xf32> to vector<8x16xf32>
    %76 = vector.extract_strided_slice %56 {offsets = [0, 48], sizes = [8, 16], strides = [1, 1]} : vector<8x96xf32> to vector<8x16xf32>
    %77 = vector.extract_strided_slice %56 {offsets = [0, 80], sizes = [8, 16], strides = [1, 1]} : vector<8x96xf32> to vector<8x16xf32>
    %cst_45 = arith.constant dense<0.000000e+00> : vector<8x8xf32>
    %78 = tpu.matmul %75, %76, %cst_45 {dimension_numbers = #tpu.dot_dimension_numbers<[1], [1], [0], [0], [0, 0, 1, 0], [], []>} : vector<8x16xf32>, vector<8x16xf32>, vector<8x8xf32> -> vector<8x8xf32>
    %cst_46 = arith.constant 2.500000e-01 : f32
    %79 = vector.broadcast %cst_46 : f32 to vector<8x8xf32>
    %80 = arith.mulf %78, %79 : vector<8x8xf32>
    %81 = vector.broadcast %5 : vector<1x8xf32> to vector<8x8xf32>
    %82 = arith.addf %80, %81 : vector<8x8xf32>
    %cst_47 = arith.constant dense<0xFF800000> : vector<8xf32>
    %83 = vector.multi_reduction <maximumf>, %82, %cst_47 [1] : vector<8x8xf32> to vector<8xf32>
    %84 = vector.shape_cast %83 : vector<8xf32> to vector<8x1xf32>
    %85 = vector.broadcast %84 : vector<8x1xf32> to vector<8x8xf32>
    %86 = arith.subf %82, %85 : vector<8x8xf32>
    %87 = math.exp %86 : vector<8x8xf32>
    %cst_48 = arith.constant dense<0.000000e+00> : vector<8xf32>
    %88 = vector.multi_reduction <add>, %87, %cst_48 [1] : vector<8x8xf32> to vector<8xf32>
    %89 = vector.shape_cast %88 : vector<8xf32> to vector<8x1xf32>
    %90 = vector.broadcast %89 : vector<8x1xf32> to vector<8x8xf32>
    %91 = arith.divf %87, %90 : vector<8x8xf32>
    %cst_49 = arith.constant dense<0.000000e+00> : vector<8x16xf32>
    %92 = tpu.matmul %91, %77, %cst_49 {dimension_numbers = #tpu.dot_dimension_numbers<[1], [0], [0], [1], [0, 0, 1, 1], [], []>} : vector<8x8xf32>, vector<8x16xf32>, vector<8x16xf32> -> vector<8x16xf32>
    %93 = tpu.concatenate %74, %92 in 1 : vector<8x16xf32>, vector<8x16xf32> -> vector<8x32xf32>
    %cst_50 = arith.constant dense<0.000000e+00> : vector<8x32xf32>
    %94 = tpu.matmul %93, %33, %cst_50 {dimension_numbers = #tpu.dot_dimension_numbers<[1], [0], [0], [1], [0, 0, 1, 1], [], []>} : vector<8x32xf32>, vector<32x32xf32>, vector<8x32xf32> -> vector<8x32xf32>
    %95 = vector.broadcast %41 : vector<1x32xf32> to vector<8x32xf32>
    %96 = arith.addf %94, %95 : vector<8x32xf32>
    %97 = arith.addf %96, %29 : vector<8x32xf32>
    %cst_51 = arith.constant dense<0.000000e+00> : vector<8xf32>
    %98 = vector.multi_reduction <add>, %97, %cst_51 [1] : vector<8x32xf32> to vector<8xf32>
    %99 = vector.shape_cast %98 : vector<8xf32> to vector<8x1xf32>
    %cst_52 = arith.constant 3.200000e+01 : f32
    %100 = vector.broadcast %cst_52 : f32 to vector<8x1xf32>
    %101 = arith.divf %99, %100 : vector<8x1xf32>
    %102 = vector.broadcast %101 : vector<8x1xf32> to vector<8x32xf32>
    %103 = arith.subf %97, %102 : vector<8x32xf32>
    %104 = arith.mulf %103, %103 : vector<8x32xf32>
    %cst_53 = arith.constant dense<0.000000e+00> : vector<8xf32>
    %105 = vector.multi_reduction <add>, %104, %cst_53 [1] : vector<8x32xf32> to vector<8xf32>
    %106 = vector.shape_cast %105 : vector<8xf32> to vector<8x1xf32>
    %cst_54 = arith.constant 3.200000e+01 : f32
    %107 = vector.broadcast %cst_54 : f32 to vector<8x1xf32>
    %108 = arith.divf %106, %107 : vector<8x1xf32>
    %cst_55 = arith.constant 9.99999996E-13 : f32
    %109 = vector.broadcast %cst_55 : f32 to vector<8x1xf32>
    %110 = arith.addf %108, %109 : vector<8x1xf32>
    %111 = math.rsqrt %110 : vector<8x1xf32>
    %112 = vector.broadcast %111 : vector<8x1xf32> to vector<8x32xf32>
    %113 = arith.mulf %103, %112 : vector<8x32xf32>
    %114 = vector.broadcast %43 : vector<1x32xf32> to vector<8x32xf32>
    %115 = arith.mulf %113, %114 : vector<8x32xf32>
    %116 = vector.broadcast %45 : vector<1x32xf32> to vector<8x32xf32>
    %117 = arith.addf %115, %116 : vector<8x32xf32>
    %cst_56 = arith.constant dense<0.000000e+00> : vector<8x64xf32>
    %118 = tpu.matmul %117, %35, %cst_56 {dimension_numbers = #tpu.dot_dimension_numbers<[1], [0], [0], [1], [0, 0, 1, 1], [], []>} : vector<8x32xf32>, vector<32x64xf32>, vector<8x64xf32> -> vector<8x64xf32>
    %119 = vector.broadcast %47 : vector<1x64xf32> to vector<8x64xf32>
    %120 = arith.addf %118, %119 : vector<8x64xf32>
    %cst_57 = arith.constant 5.000000e-01 : f32
    %121 = vector.broadcast %cst_57 : f32 to vector<8x64xf32>
    %122 = arith.mulf %121, %120 : vector<8x64xf32>
    %cst_58 = arith.constant 4.471500e-02 : f32
    %123 = vector.broadcast %cst_58 : f32 to vector<8x64xf32>
    %124 = arith.mulf %123, %120 : vector<8x64xf32>
    %125 = arith.mulf %124, %120 : vector<8x64xf32>
    %126 = arith.mulf %125, %120 : vector<8x64xf32>
    %127 = arith.addf %120, %126 : vector<8x64xf32>
    %cst_59 = arith.constant 0.797884583 : f32
    %128 = vector.broadcast %cst_59 : f32 to vector<8x64xf32>
    %129 = arith.mulf %128, %127 : vector<8x64xf32>
    %130 = math.tanh %129 : vector<8x64xf32>
    %cst_60 = arith.constant 1.000000e+00 : f32
    %131 = vector.broadcast %cst_60 : f32 to vector<8x64xf32>
    %132 = arith.addf %131, %130 : vector<8x64xf32>
    %133 = arith.mulf %122, %132 : vector<8x64xf32>
    %cst_61 = arith.constant dense<0.000000e+00> : vector<8x32xf32>
    %134 = tpu.matmul %133, %37, %cst_61 {dimension_numbers = #tpu.dot_dimension_numbers<[1], [0], [0], [1], [0, 0, 1, 1], [], []>} : vector<8x64xf32>, vector<64x32xf32>, vector<8x32xf32> -> vector<8x32xf32>
    %135 = vector.broadcast %49 : vector<1x32xf32> to vector<8x32xf32>
    %136 = arith.addf %134, %135 : vector<8x32xf32>
    %137 = arith.addf %136, %117 : vector<8x32xf32>
    %cst_62 = arith.constant dense<0.000000e+00> : vector<8xf32>
    %138 = vector.multi_reduction <add>, %137, %cst_62 [1] : vector<8x32xf32> to vector<8xf32>
    %139 = vector.shape_cast %138 : vector<8xf32> to vector<8x1xf32>
    %cst_63 = arith.constant 3.200000e+01 : f32
    %140 = vector.broadcast %cst_63 : f32 to vector<8x1xf32>
    %141 = arith.divf %139, %140 : vector<8x1xf32>
    %142 = vector.broadcast %141 : vector<8x1xf32> to vector<8x32xf32>
    %143 = arith.subf %137, %142 : vector<8x32xf32>
    %144 = arith.mulf %143, %143 : vector<8x32xf32>
    %cst_64 = arith.constant dense<0.000000e+00> : vector<8xf32>
    %145 = vector.multi_reduction <add>, %144, %cst_64 [1] : vector<8x32xf32> to vector<8xf32>
    %146 = vector.shape_cast %145 : vector<8xf32> to vector<8x1xf32>
    %cst_65 = arith.constant 3.200000e+01 : f32
    %147 = vector.broadcast %cst_65 : f32 to vector<8x1xf32>
    %148 = arith.divf %146, %147 : vector<8x1xf32>
    %cst_66 = arith.constant 9.99999996E-13 : f32
    %149 = vector.broadcast %cst_66 : f32 to vector<8x1xf32>
    %150 = arith.addf %148, %149 : vector<8x1xf32>
    %151 = math.rsqrt %150 : vector<8x1xf32>
    %152 = vector.broadcast %151 : vector<8x1xf32> to vector<8x32xf32>
    %153 = arith.mulf %143, %152 : vector<8x32xf32>
    %154 = vector.broadcast %51 : vector<1x32xf32> to vector<8x32xf32>
    %155 = arith.mulf %153, %154 : vector<8x32xf32>
    %156 = vector.broadcast %53 : vector<1x32xf32> to vector<8x32xf32>
    %157 = arith.addf %155, %156 : vector<8x32xf32>
    %c1_67 = arith.constant 1 : index
    %c0_68 = arith.constant 0 : index
    %c0_69 = arith.constant 0 : index
    %158 = vector.load %arg3[%c1_67, %c0_68, %c0_69] : memref<2x96x192xf32, #tpu.memory_space<vmem>>, vector<1x32x96xf32>
    %159 = vector.shape_cast %158 : vector<1x32x96xf32> to vector<32x96xf32>
    %c1_70 = arith.constant 1 : index
    %c0_71 = arith.constant 0 : index
    %c96_72 = arith.constant 96 : index
    %160 = vector.load %arg3[%c1_70, %c0_71, %c96_72] : memref<2x96x192xf32, #tpu.memory_space<vmem>>, vector<1x32x32xf32>
    %161 = vector.shape_cast %160 : vector<1x32x32xf32> to vector<32x32xf32>
    %c1_73 = arith.constant 1 : index
    %c0_74 = arith.constant 0 : index
    %c128_75 = arith.constant 128 : index
    %162 = vector.load %arg3[%c1_73, %c0_74, %c128_75] : memref<2x96x192xf32, #tpu.memory_space<vmem>>, vector<1x32x64xf32>
    %163 = vector.shape_cast %162 : vector<1x32x64xf32> to vector<32x64xf32>
    %c1_76 = arith.constant 1 : index
    %c32_77 = arith.constant 32 : index
    %c0_78 = arith.constant 0 : index
    %164 = vector.load %arg3[%c1_76, %c32_77, %c0_78] : memref<2x96x192xf32, #tpu.memory_space<vmem>>, vector<1x64x32xf32>
    %165 = vector.shape_cast %164 : vector<1x64x32xf32> to vector<64x32xf32>
    %c1_79 = arith.constant 1 : index
    %c0_80 = arith.constant 0 : index
    %c0_81 = arith.constant 0 : index
    %166 = vector.load %arg4[%c1_79, %c0_80, %c0_81] : memref<2x8x96xf32, #tpu.memory_space<vmem>>, vector<1x1x96xf32>
    %167 = vector.shape_cast %166 : vector<1x1x96xf32> to vector<1x96xf32>
    %c1_82 = arith.constant 1 : index
    %c1_83 = arith.constant 1 : index
    %c0_84 = arith.constant 0 : index
    %168 = vector.load %arg4[%c1_82, %c1_83, %c0_84] : memref<2x8x96xf32, #tpu.memory_space<vmem>>, vector<1x1x32xf32>
    %169 = vector.shape_cast %168 : vector<1x1x32xf32> to vector<1x32xf32>
    %c1_85 = arith.constant 1 : index
    %c2_86 = arith.constant 2 : index
    %c0_87 = arith.constant 0 : index
    %170 = vector.load %arg4[%c1_85, %c2_86, %c0_87] : memref<2x8x96xf32, #tpu.memory_space<vmem>>, vector<1x1x32xf32>
    %171 = vector.shape_cast %170 : vector<1x1x32xf32> to vector<1x32xf32>
    %c1_88 = arith.constant 1 : index
    %c3_89 = arith.constant 3 : index
    %c0_90 = arith.constant 0 : index
    %172 = vector.load %arg4[%c1_88, %c3_89, %c0_90] : memref<2x8x96xf32, #tpu.memory_space<vmem>>, vector<1x1x32xf32>
    %173 = vector.shape_cast %172 : vector<1x1x32xf32> to vector<1x32xf32>
    %c1_91 = arith.constant 1 : index
    %c4_92 = arith.constant 4 : index
    %c0_93 = arith.constant 0 : index
    %174 = vector.load %arg4[%c1_91, %c4_92, %c0_93] : memref<2x8x96xf32, #tpu.memory_space<vmem>>, vector<1x1x64xf32>
    %175 = vector.shape_cast %174 : vector<1x1x64xf32> to vector<1x64xf32>
    %c1_94 = arith.constant 1 : index
    %c5_95 = arith.constant 5 : index
    %c0_96 = arith.constant 0 : index
    %176 = vector.load %arg4[%c1_94, %c5_95, %c0_96] : memref<2x8x96xf32, #tpu.memory_space<vmem>>, vector<1x1x32xf32>
    %177 = vector.shape_cast %176 : vector<1x1x32xf32> to vector<1x32xf32>
    %c1_97 = arith.constant 1 : index
    %c6_98 = arith.constant 6 : index
    %c0_99 = arith.constant 0 : index
    %178 = vector.load %arg4[%c1_97, %c6_98, %c0_99] : memref<2x8x96xf32, #tpu.memory_space<vmem>>, vector<1x1x32xf32>
    %179 = vector.shape_cast %178 : vector<1x1x32xf32> to vector<1x32xf32>
    %c1_100 = arith.constant 1 : index
    %c7_101 = arith.constant 7 : index
    %c0_102 = arith.constant 0 : index
    %180 = vector.load %arg4[%c1_100, %c7_101, %c0_102] : memref<2x8x96xf32, #tpu.memory_space<vmem>>, vector<1x1x32xf32>
    %181 = vector.shape_cast %180 : vector<1x1x32xf32> to vector<1x32xf32>
    %cst_103 = arith.constant dense<0.000000e+00> : vector<8x96xf32>
    %182 = tpu.matmul %157, %159, %cst_103 {dimension_numbers = #tpu.dot_dimension_numbers<[1], [0], [0], [1], [0, 0, 1, 1], [], []>} : vector<8x32xf32>, vector<32x96xf32>, vector<8x96xf32> -> vector<8x96xf32>
    %183 = vector.broadcast %167 : vector<1x96xf32> to vector<8x96xf32>
    %184 = arith.addf %182, %183 : vector<8x96xf32>
    %185 = vector.extract_strided_slice %184 {offsets = [0, 0], sizes = [8, 16], strides = [1, 1]} : vector<8x96xf32> to vector<8x16xf32>
    %186 = vector.extract_strided_slice %184 {offsets = [0, 32], sizes = [8, 16], strides = [1, 1]} : vector<8x96xf32> to vector<8x16xf32>
    %187 = vector.extract_strided_slice %184 {offsets = [0, 64], sizes = [8, 16], strides = [1, 1]} : vector<8x96xf32> to vector<8x16xf32>
    %cst_104 = arith.constant dense<0.000000e+00> : vector<8x8xf32>
    %188 = tpu.matmul %185, %186, %cst_104 {dimension_numbers = #tpu.dot_dimension_numbers<[1], [1], [0], [0], [0, 0, 1, 0], [], []>} : vector<8x16xf32>, vector<8x16xf32>, vector<8x8xf32> -> vector<8x8xf32>
    %cst_105 = arith.constant 2.500000e-01 : f32
    %189 = vector.broadcast %cst_105 : f32 to vector<8x8xf32>
    %190 = arith.mulf %188, %189 : vector<8x8xf32>
    %191 = vector.broadcast %5 : vector<1x8xf32> to vector<8x8xf32>
    %192 = arith.addf %190, %191 : vector<8x8xf32>
    %cst_106 = arith.constant dense<0xFF800000> : vector<8xf32>
    %193 = vector.multi_reduction <maximumf>, %192, %cst_106 [1] : vector<8x8xf32> to vector<8xf32>
    %194 = vector.shape_cast %193 : vector<8xf32> to vector<8x1xf32>
    %195 = vector.broadcast %194 : vector<8x1xf32> to vector<8x8xf32>
    %196 = arith.subf %192, %195 : vector<8x8xf32>
    %197 = math.exp %196 : vector<8x8xf32>
    %cst_107 = arith.constant dense<0.000000e+00> : vector<8xf32>
    %198 = vector.multi_reduction <add>, %197, %cst_107 [1] : vector<8x8xf32> to vector<8xf32>
    %199 = vector.shape_cast %198 : vector<8xf32> to vector<8x1xf32>
    %200 = vector.broadcast %199 : vector<8x1xf32> to vector<8x8xf32>
    %201 = arith.divf %197, %200 : vector<8x8xf32>
    %cst_108 = arith.constant dense<0.000000e+00> : vector<8x16xf32>
    %202 = tpu.matmul %201, %187, %cst_108 {dimension_numbers = #tpu.dot_dimension_numbers<[1], [0], [0], [1], [0, 0, 1, 1], [], []>} : vector<8x8xf32>, vector<8x16xf32>, vector<8x16xf32> -> vector<8x16xf32>
    %203 = vector.extract_strided_slice %184 {offsets = [0, 16], sizes = [8, 16], strides = [1, 1]} : vector<8x96xf32> to vector<8x16xf32>
    %204 = vector.extract_strided_slice %184 {offsets = [0, 48], sizes = [8, 16], strides = [1, 1]} : vector<8x96xf32> to vector<8x16xf32>
    %205 = vector.extract_strided_slice %184 {offsets = [0, 80], sizes = [8, 16], strides = [1, 1]} : vector<8x96xf32> to vector<8x16xf32>
    %cst_109 = arith.constant dense<0.000000e+00> : vector<8x8xf32>
    %206 = tpu.matmul %203, %204, %cst_109 {dimension_numbers = #tpu.dot_dimension_numbers<[1], [1], [0], [0], [0, 0, 1, 0], [], []>} : vector<8x16xf32>, vector<8x16xf32>, vector<8x8xf32> -> vector<8x8xf32>
    %cst_110 = arith.constant 2.500000e-01 : f32
    %207 = vector.broadcast %cst_110 : f32 to vector<8x8xf32>
    %208 = arith.mulf %206, %207 : vector<8x8xf32>
    %209 = vector.broadcast %5 : vector<1x8xf32> to vector<8x8xf32>
    %210 = arith.addf %208, %209 : vector<8x8xf32>
    %cst_111 = arith.constant dense<0xFF800000> : vector<8xf32>
    %211 = vector.multi_reduction <maximumf>, %210, %cst_111 [1] : vector<8x8xf32> to vector<8xf32>
    %212 = vector.shape_cast %211 : vector<8xf32> to vector<8x1xf32>
    %213 = vector.broadcast %212 : vector<8x1xf32> to vector<8x8xf32>
    %214 = arith.subf %210, %213 : vector<8x8xf32>
    %215 = math.exp %214 : vector<8x8xf32>
    %cst_112 = arith.constant dense<0.000000e+00> : vector<8xf32>
    %216 = vector.multi_reduction <add>, %215, %cst_112 [1] : vector<8x8xf32> to vector<8xf32>
    %217 = vector.shape_cast %216 : vector<8xf32> to vector<8x1xf32>
    %218 = vector.broadcast %217 : vector<8x1xf32> to vector<8x8xf32>
    %219 = arith.divf %215, %218 : vector<8x8xf32>
    %cst_113 = arith.constant dense<0.000000e+00> : vector<8x16xf32>
    %220 = tpu.matmul %219, %205, %cst_113 {dimension_numbers = #tpu.dot_dimension_numbers<[1], [0], [0], [1], [0, 0, 1, 1], [], []>} : vector<8x8xf32>, vector<8x16xf32>, vector<8x16xf32> -> vector<8x16xf32>
    %221 = tpu.concatenate %202, %220 in 1 : vector<8x16xf32>, vector<8x16xf32> -> vector<8x32xf32>
    %cst_114 = arith.constant dense<0.000000e+00> : vector<8x32xf32>
    %222 = tpu.matmul %221, %161, %cst_114 {dimension_numbers = #tpu.dot_dimension_numbers<[1], [0], [0], [1], [0, 0, 1, 1], [], []>} : vector<8x32xf32>, vector<32x32xf32>, vector<8x32xf32> -> vector<8x32xf32>
    %223 = vector.broadcast %169 : vector<1x32xf32> to vector<8x32xf32>
    %224 = arith.addf %222, %223 : vector<8x32xf32>
    %225 = arith.addf %224, %157 : vector<8x32xf32>
    %cst_115 = arith.constant dense<0.000000e+00> : vector<8xf32>
    %226 = vector.multi_reduction <add>, %225, %cst_115 [1] : vector<8x32xf32> to vector<8xf32>
    %227 = vector.shape_cast %226 : vector<8xf32> to vector<8x1xf32>
    %cst_116 = arith.constant 3.200000e+01 : f32
    %228 = vector.broadcast %cst_116 : f32 to vector<8x1xf32>
    %229 = arith.divf %227, %228 : vector<8x1xf32>
    %230 = vector.broadcast %229 : vector<8x1xf32> to vector<8x32xf32>
    %231 = arith.subf %225, %230 : vector<8x32xf32>
    %232 = arith.mulf %231, %231 : vector<8x32xf32>
    %cst_117 = arith.constant dense<0.000000e+00> : vector<8xf32>
    %233 = vector.multi_reduction <add>, %232, %cst_117 [1] : vector<8x32xf32> to vector<8xf32>
    %234 = vector.shape_cast %233 : vector<8xf32> to vector<8x1xf32>
    %cst_118 = arith.constant 3.200000e+01 : f32
    %235 = vector.broadcast %cst_118 : f32 to vector<8x1xf32>
    %236 = arith.divf %234, %235 : vector<8x1xf32>
    %cst_119 = arith.constant 9.99999996E-13 : f32
    %237 = vector.broadcast %cst_119 : f32 to vector<8x1xf32>
    %238 = arith.addf %236, %237 : vector<8x1xf32>
    %239 = math.rsqrt %238 : vector<8x1xf32>
    %240 = vector.broadcast %239 : vector<8x1xf32> to vector<8x32xf32>
    %241 = arith.mulf %231, %240 : vector<8x32xf32>
    %242 = vector.broadcast %171 : vector<1x32xf32> to vector<8x32xf32>
    %243 = arith.mulf %241, %242 : vector<8x32xf32>
    %244 = vector.broadcast %173 : vector<1x32xf32> to vector<8x32xf32>
    %245 = arith.addf %243, %244 : vector<8x32xf32>
    %cst_120 = arith.constant dense<0.000000e+00> : vector<8x64xf32>
    %246 = tpu.matmul %245, %163, %cst_120 {dimension_numbers = #tpu.dot_dimension_numbers<[1], [0], [0], [1], [0, 0, 1, 1], [], []>} : vector<8x32xf32>, vector<32x64xf32>, vector<8x64xf32> -> vector<8x64xf32>
    %247 = vector.broadcast %175 : vector<1x64xf32> to vector<8x64xf32>
    %248 = arith.addf %246, %247 : vector<8x64xf32>
    %cst_121 = arith.constant 5.000000e-01 : f32
    %249 = vector.broadcast %cst_121 : f32 to vector<8x64xf32>
    %250 = arith.mulf %249, %248 : vector<8x64xf32>
    %cst_122 = arith.constant 4.471500e-02 : f32
    %251 = vector.broadcast %cst_122 : f32 to vector<8x64xf32>
    %252 = arith.mulf %251, %248 : vector<8x64xf32>
    %253 = arith.mulf %252, %248 : vector<8x64xf32>
    %254 = arith.mulf %253, %248 : vector<8x64xf32>
    %255 = arith.addf %248, %254 : vector<8x64xf32>
    %cst_123 = arith.constant 0.797884583 : f32
    %256 = vector.broadcast %cst_123 : f32 to vector<8x64xf32>
    %257 = arith.mulf %256, %255 : vector<8x64xf32>
    %258 = math.tanh %257 : vector<8x64xf32>
    %cst_124 = arith.constant 1.000000e+00 : f32
    %259 = vector.broadcast %cst_124 : f32 to vector<8x64xf32>
    %260 = arith.addf %259, %258 : vector<8x64xf32>
    %261 = arith.mulf %250, %260 : vector<8x64xf32>
    %cst_125 = arith.constant dense<0.000000e+00> : vector<8x32xf32>
    %262 = tpu.matmul %261, %165, %cst_125 {dimension_numbers = #tpu.dot_dimension_numbers<[1], [0], [0], [1], [0, 0, 1, 1], [], []>} : vector<8x64xf32>, vector<64x32xf32>, vector<8x32xf32> -> vector<8x32xf32>
    %263 = vector.broadcast %177 : vector<1x32xf32> to vector<8x32xf32>
    %264 = arith.addf %262, %263 : vector<8x32xf32>
    %265 = arith.addf %264, %245 : vector<8x32xf32>
    %cst_126 = arith.constant dense<0.000000e+00> : vector<8xf32>
    %266 = vector.multi_reduction <add>, %265, %cst_126 [1] : vector<8x32xf32> to vector<8xf32>
    %267 = vector.shape_cast %266 : vector<8xf32> to vector<8x1xf32>
    %cst_127 = arith.constant 3.200000e+01 : f32
    %268 = vector.broadcast %cst_127 : f32 to vector<8x1xf32>
    %269 = arith.divf %267, %268 : vector<8x1xf32>
    %270 = vector.broadcast %269 : vector<8x1xf32> to vector<8x32xf32>
    %271 = arith.subf %265, %270 : vector<8x32xf32>
    %272 = arith.mulf %271, %271 : vector<8x32xf32>
    %cst_128 = arith.constant dense<0.000000e+00> : vector<8xf32>
    %273 = vector.multi_reduction <add>, %272, %cst_128 [1] : vector<8x32xf32> to vector<8xf32>
    %274 = vector.shape_cast %273 : vector<8xf32> to vector<8x1xf32>
    %cst_129 = arith.constant 3.200000e+01 : f32
    %275 = vector.broadcast %cst_129 : f32 to vector<8x1xf32>
    %276 = arith.divf %274, %275 : vector<8x1xf32>
    %cst_130 = arith.constant 9.99999996E-13 : f32
    %277 = vector.broadcast %cst_130 : f32 to vector<8x1xf32>
    %278 = arith.addf %276, %277 : vector<8x1xf32>
    %279 = math.rsqrt %278 : vector<8x1xf32>
    %280 = vector.broadcast %279 : vector<8x1xf32> to vector<8x32xf32>
    %281 = arith.mulf %271, %280 : vector<8x32xf32>
    %282 = vector.broadcast %179 : vector<1x32xf32> to vector<8x32xf32>
    %283 = arith.mulf %281, %282 : vector<8x32xf32>
    %284 = vector.broadcast %181 : vector<1x32xf32> to vector<8x32xf32>
    %285 = arith.addf %283, %284 : vector<8x32xf32>
    %286 = vector.extract_strided_slice %285 {offsets = [0, 0], sizes = [1, 32], strides = [1, 1]} : vector<8x32xf32> to vector<1x32xf32>
    %c0_131 = arith.constant 0 : index
    %c0_132 = arith.constant 0 : index
    %287 = vector.load %arg5[%c0_131, %c0_132] : memref<68x32xf32, #tpu.memory_space<vmem>>, vector<32x32xf32>
    %c66 = arith.constant 66 : index
    %c0_133 = arith.constant 0 : index
    %288 = vector.load %arg5[%c66, %c0_133] : memref<68x32xf32, #tpu.memory_space<vmem>>, vector<1x32xf32>
    %c32_134 = arith.constant 32 : index
    %c0_135 = arith.constant 0 : index
    %289 = vector.load %arg5[%c32_134, %c0_135] : memref<68x32xf32, #tpu.memory_space<vmem>>, vector<32x3xf32>
    %c67 = arith.constant 67 : index
    %c0_136 = arith.constant 0 : index
    %290 = vector.load %arg5[%c67, %c0_136] : memref<68x32xf32, #tpu.memory_space<vmem>>, vector<1x3xf32>
    %cst_137 = arith.constant dense<0.000000e+00> : vector<1x32xf32>
    %291 = tpu.matmul %286, %287, %cst_137 {dimension_numbers = #tpu.dot_dimension_numbers<[1], [0], [0], [1], [0, 0, 1, 1], [], []>} : vector<1x32xf32>, vector<32x32xf32>, vector<1x32xf32> -> vector<1x32xf32>
    %292 = arith.addf %291, %288 : vector<1x32xf32>
    %293 = math.tanh %292 : vector<1x32xf32>
    %cst_138 = arith.constant dense<0.000000e+00> : vector<1x3xf32>
    %294 = tpu.matmul %293, %289, %cst_138 {dimension_numbers = #tpu.dot_dimension_numbers<[1], [0], [0], [1], [0, 0, 1, 1], [], []>} : vector<1x32xf32>, vector<32x3xf32>, vector<1x3xf32> -> vector<1x3xf32>
    %295 = arith.addf %294, %290 : vector<1x3xf32>
    %c0_139 = arith.constant 0 : index
    %c0_140 = arith.constant 0 : index
    %c0_141 = arith.constant 0 : index
    %296 = vector.load %arg6[%c0_139, %c0_140, %c0_141] : memref<1x1x3xf32, #tpu.memory_space<vmem>>, vector<1x1x3xf32>
    %297 = vector.shape_cast %296 : vector<1x1x3xf32> to vector<1x3xf32>
    %298 = vector.shape_cast %295 : vector<1x3xf32> to vector<1x1x3xf32>
    tpu.vector_store %arg6[%c0_139, %c0_140, %c0_141], %298 {strides = array<i32>} : memref<1x1x3xf32, #tpu.memory_space<vmem>>, vector<1x1x3xf32>,
    return
  }
  func.func @transform_0(%arg0: i32) -> (i32, i32, i32) {
    %c0_i32 = arith.constant 0 : i32
    %c0_i32_0 = arith.constant 0 : i32
    %c0_i32_1 = arith.constant 0 : i32
    return %arg0, %c0_i32, %c0_i32_0 : i32, i32, i32
  }
  func.func @transform_1(%arg0: i32) -> (i32, i32, i32) {
    %c0_i32 = arith.constant 0 : i32
    %c0_i32_0 = arith.constant 0 : i32
    %c0_i32_1 = arith.constant 0 : i32
    return %arg0, %c0_i32, %c0_i32_0 : i32, i32, i32
  }
  func.func @transform_2(%arg0: i32) -> (i32, i32, i32) {
    %c0_i32 = arith.constant 0 : i32
    %c0_i32_0 = arith.constant 0 : i32
    %c0_i32_1 = arith.constant 0 : i32
    %c0_i32_2 = arith.constant 0 : i32
    return %c0_i32, %c0_i32_0, %c0_i32_1 : i32, i32, i32
  }
  func.func @transform_3(%arg0: i32) -> (i32, i32, i32) {
    %c0_i32 = arith.constant 0 : i32
    %c0_i32_0 = arith.constant 0 : i32
    %c0_i32_1 = arith.constant 0 : i32
    %c0_i32_2 = arith.constant 0 : i32
    return %c0_i32, %c0_i32_0, %c0_i32_1 : i32, i32, i32
  }
  func.func @transform_4(%arg0: i32) -> (i32, i32) {
    %c0_i32 = arith.constant 0 : i32
    %c0_i32_0 = arith.constant 0 : i32
    %c0_i32_1 = arith.constant 0 : i32
    return %c0_i32, %c0_i32_0 : i32, i32
  }
  func.func @transform_5(%arg0: i32) -> (i32, i32, i32) {
    %c0_i32 = arith.constant 0 : i32
    %c0_i32_0 = arith.constant 0 : i32
    %c0_i32_1 = arith.constant 0 : i32
    return %arg0, %c0_i32, %c0_i32_0 : i32, i32, i32
  }
}

</mosaic_0001>

<bundles_post_ra>
// kernel: bert_classify_forward.1
= control target key start
LH: loop header
LB: loop body
LE: loop exit
PB: predicated region body
PF: predicated region fallthrough
CT: control target
= control target key end

     0   :  { %10 = vsyncpa [#allocation3], 0  ;;  %s3049_s0 = inlined_call_operand.vmem [shape: f32[2,8,32], index: 0, kind: input, shape index: {}]   ;;  %s3050_s1 = inlined_call_operand.vmem [shape: f32[2,1,8], index: 1, kind: input, shape index: {}]   ;;  %s3051_s2 = inlined_call_operand.vmem [shape: f32[2,96,192], index: 2, kind: input, shape index: {}]   ;;  %s3052_s3 = inlined_call_operand.vmem [shape: f32[2,8,96], index: 3, kind: input, shape index: {}]   ;;  %s3053_s4 = inlined_call_operand.vmem [shape: f32[68,32], index: 4, kind: input, shape index: {}]   ;;  %s3054_s5 = inlined_call_operand.hbm [shape: f32[2,1,3], index: 5, kind: output, shape index: {}]  }
   0x1   :  { %12 = vsyncpa [#allocation3 + $0x1], 0  ;;  %s2587_s18 = smov 0   ;;  %s2589_s19 = smov 0  }
   0x2   :  { %s2591_s20 = smov 0   ;;  %s2593_s21 = smov 0  }
   0x3 LB: > { %s2608_s22 = sadd.s32 4294967295, %s2544_s21   ;;  %s1997_s23 = sadd.s32 4294967294, %s2544_s21   ;;  %s2544_s21 = sphi %s2593_s21, %s3060_s21   ;;  %s2540_s20 = sphi %s2591_s20, %s3059_s20   ;;  %s2536_s19 = sphi %s2589_s19, %s3058_s19   ;;  %s2532_s18 = sphi %s2587_s18, %s3057_s18  }
   0x4   : > { %s2612_s24 = sadd.s32 1, %s2544_s21   ;;  %s140_s25 = sadd.s32 1, %s2540_s20 }
   0x5   : > { %s137_s26 = ssub.s32 %s2544_s21, %s2612_s24  ;;  %p150_p0 = scmp.ne.s32.totalorder %s2540_s20, %s2536_s19 }
   0x6   : > { %p138_p1 = scmp.eq.s32.totalorder %s137_s26, 0  ;;  %p151_p2 = scmp.eq.s32.totalorder %s2608_s22, 1 }
   0x7   : > { %p156_p3 = scmp.ne.s32.totalorder %s2536_s19, %s2532_s18  ;;  %p157_p4 = scmp.eq.s32.totalorder %s1997_s23, 1 }
   0x8   : > { %s2623_s27 = scalar_select %p138_p1, %s2540_s20, %s140_s25  }
   0x9   : > { %p2625_p5 = por %p151_p2, %p150_p0  ;;  %p2629_p6 = por %p157_p4, %p156_p3 }
   0xa   : > { %p2000_p7 = scmp.ge.s32.totalorder %s2544_s21, 1  ;;  %p197_p8 = scmp.lt.s32.totalorder %s2544_s21, 3 }
   0xc   : > { %p198_p9 = pnand %p2000_p7, %p197_p8 }
   0xd   : > { %p226_p10 = scmp.lt.s32.totalorder (!%p198_p9), %s2608_s22, 1  ;;  %vm239_vm0 = vcmask (!%p198_p9), 261120   ;;  %v2648_v7 = vld [vmem:[%s3051_s2] sm:$0xff] (!%p198_p9)  ;;  %v2653_v8 = vld [vmem:[%s3051_s2 + $0x10] sm:$0xff] (!%p198_p9)  ;;  %v2546_v10 = vmov (!%p198_p9), 0.0|0.0   ;;  %vm2547_vm1 = vmmov (!%p198_p9), 0   ;;  %v445_v32 = vlaneseq (!%p198_p9) }
   0xe   : > { %201 = sbr.rel (%p198_p9) target bundleno = 5774 (0x168e), region = 40  ;;  %v2658_v9 = vld [vmem:[%s3051_s2 + $0x20] sm:$0xff] (!%p198_p9)  ;;  %2309 = vmatprep.subr.bf16.mxu0 (!%p198_p9), %v2546_v10  ;;  %v2430_v11 = vpack.i.bf16 (!%p198_p9), %v2653_v8, %v2648_v7  ;;  %v2310_v12 = vpack.c.bf16 (!%p198_p9), %v2653_v8, %v2648_v7  ;;  %v2668_v13 = vld [vmem:[%s3051_s2 + $0x30] sm:$0xff] (!%p198_p9)  ;;  %v2548_v14 = vmov (!%p198_p9), 0.0   ;;  %s2550_s10 = smov (!%p198_p9), 96   ;;  %vm368_vm2 = vcmask (!%p198_p9), 130048  }
   0xf   : > { %2151 = vmatprep.mubr.msk.f32.mxu0 (!%p198_p9), %vm2547_vm1, %v2548_v14  ;;  %2154 = vmatprep.subr.mxu1 (!%p198_p9), %v2548_v14  ;;  %v2313_v15 = vpack.c.bf16 (!%p198_p9), %v2668_v13, %v2658_v9  ;;  %v2002_v20 = vld [vmem:[%s3053_s4 + $0x40] ss:$0 sm:$0xff] (!%p198_p9)  ;;  %v2003_v22 = vld [vmem:[%s3053_s4 + $0x41] ss:$0 sm:$0xff] (!%p198_p9)  ;;  %s2551_s11 = smov (!%p198_p9), 80   ;;  %v446_v35 = vshrl.u32 (!%p198_p9), %v445_v32, 7  ;;  %v2435_v59 = vpack.i.bf16 (!%p198_p9), %v2668_v13, %v2658_v9 }
  0x10   : > { %2156 = vmatprep.mubr.msk.f32.mxu1 (!%p198_p9), %vm2547_vm1, %v2548_v14  ;;  %2311 = vmatpush3.bf16.msra.mxu0 (!%p198_p9), %v2310_v12  ;;  %v2004_v25 = vld [vmem:[%s3052_s3] ss:$0 sm:$0xff] (!%p198_p9)  ;;  %vm451_vm3 = vcmask (!%p198_p9), 64512   ;;  %s2553_s15 = smov (!%p198_p9), 64   ;;  %s2554_s16 = smov (!%p198_p9), 32   ;;  %v268_v32 = vld [vmem:[%s3051_s2 + $0x8] sm:$0xff] (!%p198_p9) }
  0x11   : > { %2312 = vmatprep.subr.bf16.mxu0 (!%p198_p9), %v2546_v10  ;;  %v447_v37 = vsub.s32 (!%p198_p9), 0, %v446_v35  ;;  %s2555_s17 = smov (!%p198_p9), 16   ;;  %v271_v35 = vld [vmem:[%s3051_s2 + $0x38] sm:$0xff] (!%p198_p9)  ;;  %vm918_vm4 = vcmask (!%p198_p9), 523264   ;;  %s224_s7 = sand.u32 (!%p198_p9), 1, %s2536_s19   ;;  %vm1918_vm5 = vcmask (!%p198_p9), 16384  }
  0x12   : > { %s2066_s13 = sshll.u32 (!%p198_p9), %s2608_s22, 4 }
  0x14   : > { %2314 = vmatpush3.bf16.msra.mxu0 (!%p198_p9), %v2313_v15 }
  0x15   : > { %s2637_s30 = scalar_select %p226_p10, %s2608_s22, 1  ;;  %2164 = vmatprep.subr.mxu0 %v2548_v14 }
  0x16   : > { %s2556_s22 = smov [#allocation2]  }
  0x17   : > { %s2001_s6 = sshll.u32 %s2637_s30, 3  ;;  %s232_s14 = scalar_lea.vmem %s3050_s1, %s2637_s30 }
  0x18   : > { %s229_s9 = scalar_lea.vmem %s3049_s0, %s2001_s6  ;;  %v233_v33 = vld [vmem:[%s232_s14] sm:$0x1]  ;;  %s2552_s30 = smov 48  }
  0x19   : > { %v236_v0 = vld [vmem:[%s229_s9] sm:$0xff]  ;;  %s2549_s9 = smov 112   ;;  %v234_v34 = vsub.f32 1.0, %v233_v33  ;;  %v269_v33 = vld [vmem:[%s3051_s2 + $0x18] sm:$0xff]  ;;  %s225_s14 = scalar_lea.vmem [#allocation2], %s224_s7 }
  0x1a   : > { %v240_v1 = vsel %vm239_vm0, %v236_v0, 0.0  ;;  %s1933_s23 = sshll.u32 %s225_s14, 4  ;;  %s3009_s23 = int_to_ptr.vmem [resolvable:$true] %s1933_s23 }
  0x1b   : > { %241 = vadd.xlane.f32.xlu0 %v240_v1  ;;  %v235_v36 = vmul.f32 -10000.0, %v234_v34  ;;  %v2322_v34 = vpack.c.bf16 %v269_v33, %v268_v32  ;;  %v2020_v32 = vld [vmem:[%s3052_s3 + $0x6] ss:$0 sm:$0xff] }
  0x1d   : > { %v2711_v38 = vrot.slane %v235_v36, %v447_v37 }
  0xa8   : > { %v242_v2 = vpop.xlane.xlu0 %241 }
  0xa9   : > { %v244_v3 = vmul.f32 0.03125, %v242_v2 }
  0xab   : > { %v245_v4 = vsub.f32 %v236_v0, %v244_v3 }
  0xad   : > { %v246_v5 = vmul.f32 %v245_v4, %v245_v4 }
  0xaf   : > { %v247_v6 = vsel %vm239_vm0, %v246_v5, 0.0 }
  0xb0   : > { %248 = vadd.xlane.f32.xlu0 %v247_v6 }
 0x13d   : > { %v249_v16 = vpop.xlane.xlu0 %248 }
 0x13e   : > { %v250_v17 = vmul.f32 0.03125, %v249_v16 }
 0x140   : > { %v251_v18 = vadd.f32 1e-12, %v250_v17 }
 0x142   : > { %2450 = vrsqrt.f32 %v251_v18 }
 0x14c   : > { %v2451_v19 = vpop.eup %2450 }
 0x14d   : > { %v253_v21 = vmul.f32 %v2451_v19, %v245_v4 }
 0x14f   : > { %v258_v23 = vmul.f32 %v2002_v20, %v253_v21  ;;  %v2012_v20 = vld [vmem:[%s3052_s3 + $0x1] ss:$0 sm:$0xff] }
 0x151   : > { %v2685_v24 = vadd.f32 %v2003_v22, %v258_v23 }
 0x153   : > { %2152 = vmatmul.mubr.msk.f32.vlgmr.msra.gmra.mrb[0].mxu0 %vm239_vm0, %v2685_v24 }
 0x154   : > { %2166 = vmatprep.mubr.msk.f32.mxu0 %vm2547_vm1, %v2548_v14 }
 0x226   : > { %v361_v26 = vpop.f32.mrb[0].mxu0 }
 0x227   : > { %v362_v27 = vadd.f32 %v2004_v25, %v361_v26  ;;  %v2153_v28 = vpop.f32.mrb[1].mxu0 }
 0x229   : > { %539 = vrot.lane.b32.xlu0 %v362_v27, %s2549_s9  ;;  %366 = vrot.lane.b32.xlu1 %v362_v27, %s2550_s10 }
 0x22d   : > { %541 = vrot.lane.b32.xlu1 %v362_v27, %s2551_s11 }
 0x29b   : > { %v367_v29 = vpop.permute.xlu1 %366  ;;  %v540_v31 = vpop.permute.xlu0 %539 }
 0x29c   : > { %2155 = vmatpush3.xpose.msk.msra.mxu1 %vm368_vm2, %v367_v29 }
 0x29d   : > { %2159 = vmatprep.subr.mxu1 %v2548_v14 }
 0x29f   : > { %2157 = vmatmul.mubr.msk.f32.vlgmr.msra.gmra.mrb[0].mxu1 %vm368_vm2, %v362_v27  ;;  %v542_v30 = vpop.permute.xlu1 %541 }
 0x2a0   : > { %2165 = vmatpush3.xpose.msk.msra.mxu0 %vm368_vm2, %v542_v30  ;;  %2161 = vmatprep.mubr.msk.f32.mxu1 %vm2547_vm1, %v2548_v14 }
 0x2a1   : > { %2315 = vmatprep.subr.bf16.mxu0 %v2546_v10 }
 0x2a3   : > { %2167 = vmatmul.mubr.msk.f32.vlgmr.msra.gmra.mrb[2].mxu0 %vm368_vm2, %v540_v31 }
 0x2a4   : > { %2182 = vmatprep.mubr.msk.f32.mxu0 %vm2547_vm1, %v2548_v14 }
 0x372   : > { %v439_v39 = vpop.f32.mrb[0].mxu1 }
 0x373   : > { %v443_v40 = vmul.f32 0.25, %v439_v39  ;;  %v2158_v41 = vpop.f32.mrb[1].mxu1 }
 0x375   : > { %v450_v42 = vadd.f32 %v2711_v38, %v443_v40 }
 0x376   : > { %v613_v43 = vpop.f32.mrb[2].mxu0 }
 0x377   : > { %v617_v44 = vmul.f32 0.25, %v613_v43  ;;  %v2168_v45 = vpop.f32.mrb[3].mxu0  ;;  %v452_v46 = vsel %vm451_vm3, %v450_v42, -inf }
 0x378   : > { %453 = vmax.xlane.f32.xlu1 %v452_v46 }
 0x379   : > { %v618_v47 = vadd.f32 %v617_v44, %v2711_v38  ;;  %v2015_v44 = vld [vmem:[%s3052_s3 + $0x3] ss:$0 sm:$0xff] }
 0x37b   : > { %v619_v48 = vsel %vm451_vm3, %v618_v47, -inf }
 0x37c   : > { %620 = vmax.xlane.f32.xlu0 %v619_v48  ;;  %v273_v48 = vld [vmem:[%s3051_s2 + $0x50] sm:$0xff] }
 0x392   : > { %630 = vrot.lane.b32.xlu0 %v362_v27, %s2552_s30 }
 0x405   : > { %v454_v49 = vpop.xlane.xlu1 %453 }
 0x406   : > { %v455_v50 = vsub.f32 %v450_v42, %v454_v49  ;;  %v2014_v42 = vld [vmem:[%s3052_s3 + $0x2] ss:$0 sm:$0xff] }
 0x408   : > { %v456_v51 = vmul.f32 1.442695, %v455_v50  ;;  %v274_v50 = vld [vmem:[%s3051_s2 + $0x60] sm:$0xff] }
 0x409   : > { %v621_v52 = vpop.xlane.xlu0 %620 }
 0x40a   : > { %2452 = vpow2.f32 %v456_v51  ;;  %v622_v53 = vsub.f32 %v618_v47, %v621_v52  ;;  %v272_v47 = vld [vmem:[%s3051_s2 + $0x40] sm:$0xff]  ;;  %v275_v51 = vld [vmem:[%s3051_s2 + $0x70] sm:$0xff] }
 0x40b   : > { %v2328_v49 = vpack.c.bf16 %v273_v48, %v272_v47  ;;  %v2331_v52 = vpack.c.bf16 %v275_v51, %v274_v50 }
 0x40c   : > { %v623_v54 = vmul.f32 1.442695, %v622_v53  ;;  %v276_v53 = vld [vmem:[%s3051_s2 + $0x80] sm:$0xff] }
 0x40d   : > { %v631_v1 = vpop.permute.xlu0 %630 }
 0x40e   : > { %2454 = vpow2.f32 %v623_v54  ;;  %v277_v54 = vld [vmem:[%s3051_s2 + $0x90] sm:$0xff] }
 0x414   : > { %v2453_v55 = vpop.eup %2452 }
 0x415   : > { %v458_v56 = vsel %vm451_vm3, %v2453_v55, 0.0 }
 0x416   : > { %459 = vadd.xlane.f32.xlu1 %v458_v56  ;;  %v278_v56 = vld [vmem:[%s3051_s2 + $0xa0] sm:$0xff] }
 0x418   : > { %v2455_v57 = vpop.eup %2454 }
 0x419   : > { %v625_v58 = vsel %vm451_vm3, %v2455_v57, 0.0 }
 0x41a   : > { %626 = vadd.xlane.f32.xlu1 %v625_v58 }
 0x42b   : > { %463 = vrot.lane.b32.xlu1 %v362_v27, %s2553_s15 }
 0x42f   : > { %2431 = vrot.lane.b32.xlu1 %v2430_v11, %s2554_s16 }
 0x433   : > { %2436 = vrot.lane.b32.xlu1 %v2435_v59, %s2554_s16  ;;  %v2016_v59 = vld [vmem:[%s3052_s3 + $0x4] ss:$0 sm:$0xff] }
 0x4a3   : > { %v460_v60 = vpop.xlane.xlu1 %459 }
 0x4a4   : > { %2456 = vrcp.f32 %v460_v60 }
 0x4a7   : > { %v627_v61 = vpop.xlane.xlu1 %626 }
 0x4a8   : > { %2458 = vrcp.f32 %v627_v61 }
 0x4ab   : > { %v464_v62 = vpop.permute.xlu1 %463 }
 0x4ac   : > { %2160 = vmatpush3.msra.mxu1 %v464_v62 }
 0x4ad   : > { %2169 = vmatprep.subr.mxu1 %v2548_v14 }
 0x4ae   : > { %v2457_v63 = vpop.eup %2456 }
 0x4af   : > { %v462_v0 = vmul.f32 %v2457_v63, %v2453_v55  ;;  %v2432_v4 = vpop.permute.xlu1 %2431  ;;  %v2334_v55 = vpack.c.bf16 %v277_v54, %v276_v53 }
 0x4b0   : > { %v2434_v5 = vunpack.i.h.bf16 %v2432_v4  ;;  %v2433_v6 = vunpack.i.l.bf16 %v2432_v4 }
 0x4b1   : > { %2162 = vmatmul.mubr.msk.f32.vlgmr.msra.gmra.mrb[2].mxu1 %vm451_vm3, %v462_v0 }
 0x4b2   : > { %v2459_v2 = vpop.eup %2458  ;;  %2170 = vmatpush3.msra.mxu1 %v631_v1  ;;  %2171 = vmatprep.mubr.msk.f32.mxu1 %vm2547_vm1, %v2548_v14  ;;  %v2316_v7 = vpack.c.bf16 %v2434_v5, %v2433_v6 }
 0x4b3   : > { %v629_v3 = vmul.f32 %v2459_v2, %v2455_v57  ;;  %2321 = vmatprep.subr.bf16.mxu1 %v2546_v10  ;;  %v2437_v8 = vpop.permute.xlu1 %2436  ;;  %v279_v57 = vld [vmem:[%s3051_s2 + $0xb0] sm:$0xff] }
 0x4b4   : > { %v2439_v9 = vunpack.i.h.bf16 %v2437_v8  ;;  %v2438_v11 = vunpack.i.l.bf16 %v2437_v8  ;;  %2317 = vmatpush3.bf16.msra.mxu0 %v2316_v7  ;;  %v2337_v58 = vpack.c.bf16 %v279_v57, %v278_v56  ;;  %v2018_v8 = vld [vmem:[%s3052_s3 + $0x5] ss:$0 sm:$0xff] }
 0x4b5   : > { %2172 = vmatmul.mubr.msk.f32.vlgmr.msra.gmra.mrb[4].mxu1 %vm451_vm3, %v629_v3  ;;  %2318 = vmatprep.subr.bf16.mxu0 %v2546_v10 }
 0x4b6   : > { %2193 = vmatprep.mubr.msk.f32.mxu1 %vm2547_vm1, %v2548_v14  ;;  %v2319_v12 = vpack.c.bf16 %v2439_v9, %v2438_v11  ;;  %2323 = vmatpush3.bf16.msra.mxu1 %v2322_v34  ;;  %v2021_v34 = vld [vmem:[%s3052_s3 + $0x7] ss:$0 sm:$0xff] }
 0x4b7   : > { %2324 = vmatprep.subr.bf16.mxu1 %v2546_v10 }
 0x4b8   : > { %2320 = vmatpush3.bf16.msra.mxu0 %v2319_v12 }
 0x4b9   : > { %2327 = vmatprep.subr.bf16.mxu0 %v2546_v10 }
 0x584   : > { %v535_v13 = vpop.f32.mrb[2].mxu1 }
 0x585   : > { %v2163_v15 = vpop.f32.mrb[3].mxu1 }
 0x588   : > { %v702_v16 = vpop.f32.mrb[4].mxu1 }
 0x589   : > { %707 = vrot.lane.b32.xlu1 %v702_v16, %s2555_s17  ;;  %v2173_v17 = vpop.f32.mrb[5].mxu1 }
 0x5fb   : > { %v708_v18 = vpop.permute.xlu1 %707 }
 0x5fc   : > { %v710_v19 = vsel %vm368_vm2, %v535_v13, %v708_v18 }
 0x5fd   : > { %2183 = vmatmul.mubr.msk.f32.vlgmr.msra.gmra.mrb[4].mxu0 %vm239_vm0, %v710_v19 }
 0x5fe   : > { %2212 = vmatprep.mubr.msk.f32.mxu0 %vm2547_vm1, %v2548_v14  ;;  %2329 = vmatpush3.bf16.msra.mxu0 %v2328_v49 }
 0x5ff   : > { %2330 = vmatprep.subr.bf16.mxu0 %v2546_v10 }
 0x602   : > { %2332 = vmatpush3.bf16.msra.mxu0 %v2331_v52 }
 0x603   : > { %2333 = vmatprep.subr.bf16.mxu0 %v2546_v10 }
 0x606   : > { %2335 = vmatpush3.bf16.msra.mxu0 %v2334_v55 }
 0x607   : > { %2336 = vmatprep.subr.bf16.mxu0 %v2546_v10 }
 0x60a   : > { %2338 = vmatpush3.bf16.msra.mxu0 %v2337_v58 }
 0x60b   : > { %2236 = vmatprep.subr.mxu0 %v2548_v14 }
 0x6d0   : > { %v800_v21 = vpop.f32.mrb[4].mxu0 }
 0x6d1   : > { %v801_v22 = vadd.f32 %v2012_v20, %v800_v21  ;;  %v2184_v23 = vpop.f32.mrb[5].mxu0  ;;  %v2814_v21 = vld [vmem:[%s3051_s2 + $0xc0] sm:$0xff] }
 0x6d3   : > { %v804_v25 = vadd.f32 %v801_v22, %v2685_v24  ;;  %v270_v24 = vld [vmem:[%s3051_s2 + $0x28] sm:$0xff]  ;;  %v2819_v22 = vld [vmem:[%s3051_s2 + $0xd0] sm:$0xff] }
 0x6d4   : > { %v2325_v36 = vpack.c.bf16 %v271_v35, %v270_v24  ;;  %v2340_v23 = vpack.c.bf16 %v2819_v22, %v2814_v21 }
 0x6d5   : > { %v805_v26 = vsel %vm239_vm0, %v804_v25, 0.0 }
 0x6d6   : > { %806 = vadd.xlane.f32.xlu1 %v805_v26  ;;  %2326 = vmatpush3.bf16.msra.mxu1 %v2325_v36  ;;  %v2831_v26 = vld [vmem:[%s3051_s2 + $0xf0] sm:$0xff]  ;;  %v2046_v36 = vld [vmem:[%s3052_s3 + $0x8] ss:$0 sm:$0xff] }
 0x6d7   : > { %2339 = vmatprep.subr.bf16.mxu1 %v2546_v10 }
 0x763   : > { %v807_v27 = vpop.xlane.xlu1 %806 }
 0x764   : > { %v808_v28 = vmul.f32 0.03125, %v807_v27 }
 0x766   : > { %v809_v29 = vsub.f32 %v804_v25, %v808_v28  ;;  %v2826_v25 = vld [vmem:[%s3051_s2 + $0xe0] sm:$0xff] }
 0x767   : > { %v2343_v27 = vpack.c.bf16 %v2831_v26, %v2826_v25 }
 0x768   : > { %v810_v30 = vmul.f32 %v809_v29, %v809_v29 }
 0x76a   : > { %v811_v31 = vsel %vm239_vm0, %v810_v30, 0.0 }
 0x76b   : > { %812 = vadd.xlane.f32.xlu0 %v811_v31 }
 0x7f8   : > { %v813_v37 = vpop.xlane.xlu0 %812 }
 0x7f9   : > { %v814_v39 = vmul.f32 0.03125, %v813_v37 }
 0x7fb   : > { %v815_v40 = vadd.f32 1e-12, %v814_v39 }
 0x7fd   : > { %2460 = vrsqrt.f32 %v815_v40 }
 0x807   : > { %v2461_v41 = vpop.eup %2460 }
 0x808   : > { %v817_v43 = vmul.f32 %v2461_v41, %v809_v29 }
 0x80a   : > { %v822_v45 = vmul.f32 %v2014_v42, %v817_v43 }
 0x80c   : > { %v827_v46 = vadd.f32 %v2015_v44, %v822_v45 }
 0x80e   : > { %2194 = vmatmul.mubr.msk.f32.vlgmr.msra.gmra.mrb[6].mxu1 %vm239_vm0, %v827_v46 }
 0x80f   : > { %2223 = vmatprep.mubr.msk.f32.mxu1 %vm2547_vm1, %v2548_v14  ;;  %2341 = vmatpush3.bf16.msra.mxu1 %v2340_v23 }
 0x810   : > { %2342 = vmatprep.subr.bf16.mxu1 %v2546_v10 }
 0x813   : > { %2344 = vmatpush3.bf16.msra.mxu1 %v2343_v27 }
 0x814   : > { %2226 = vmatprep.subr.mxu1 %v2548_v14 }
 0x8e1   : > { %v901_v60 = vpop.f32.mrb[6].mxu1 }
 0x8e2   : > { %v902_v61 = vadd.f32 %v2016_v59, %v901_v60  ;;  %v2195_v62 = vpop.f32.mrb[7].mxu1 }
 0x8e4   : > { %v906_v63 = vmul.f32 0.044715, %v902_v61  ;;  %v905_v5 = vmul.f32 0.5, %v902_v61 }
 0x8e6   : > { %v907_v0 = vmul.f32 %v906_v63, %v902_v61 }
 0x8e8   : > { %v908_v1 = vmul.f32 %v907_v0, %v902_v61  ;;  %v2440_v0 = vpack.i.bf16 %v2819_v22, %v2814_v21 }
 0x8ea   : > { %v909_v2 = vadd.f32 %v908_v1, %v902_v61  ;;  %v2445_v1 = vpack.i.bf16 %v2831_v26, %v2826_v25  ;;  %v2054_v26 = vld [vmem:[%s3052_s3 + $0x9] ss:$0 sm:$0xff] }
 0x8ec   : > { %v910_v3 = vmul.f32 0.7978846, %v909_v2 }
 0x8ee   : > { %2462 = vtanh.f32 %v910_v3 }
 0x8f8   : > { %v2463_v4 = vpop.eup %2462 }
 0x8f9   : > { %v912_v6 = vadd.f32 1.0, %v2463_v4 }
 0x8fb   : > { %v913_v7 = vmul.f32 %v912_v6, %v905_v5 }
 0x8fd   : > { %2213 = vmatmul.mubr.msk.f32.vlgmr.msra.gmra.mrb[6].mxu0 %vm918_vm4, %v913_v7 }
 0x8fe   : > { %2238 = vmatprep.mubr.msk.f32.mxu0 %vm2547_vm1, %v2548_v14 }
 0x9d0   : > { %v988_v9 = vpop.f32.mrb[6].mxu0 }
 0x9d1   : > { %v989_v11 = vadd.f32 %v2018_v8, %v988_v9  ;;  %v2214_v12 = vpop.f32.mrb[7].mxu0 }
 0x9d3   : > { %v992_v13 = vadd.f32 %v989_v11, %v827_v46 }
 0x9d5   : > { %v993_v15 = vsel %vm239_vm0, %v992_v13, 0.0 }
 0x9d6   : > { %994 = vadd.xlane.f32.xlu0 %v993_v15 }
 0xa63   : > { %v995_v16 = vpop.xlane.xlu0 %994 }
 0xa64   : > { %v996_v17 = vmul.f32 0.03125, %v995_v16 }
 0xa66   : > { %v997_v18 = vsub.f32 %v992_v13, %v996_v17 }
 0xa68   : > { %v998_v19 = vmul.f32 %v997_v18, %v997_v18 }
 0xa6a   : > { %v999_v20 = vsel %vm239_vm0, %v998_v19, 0.0 }
 0xa6b   : > { %1000 = vadd.xlane.f32.xlu1 %v999_v20 }
 0xaf8   : > { %v1001_v28 = vpop.xlane.xlu1 %1000 }
 0xaf9   : > { %v1002_v29 = vmul.f32 0.03125, %v1001_v28 }
 0xafb   : > { %v1003_v30 = vadd.f32 1e-12, %v1002_v29 }
 0xafd   : > { %2464 = vrsqrt.f32 %v1003_v30 }
 0xb07   : > { %v2465_v31 = vpop.eup %2464 }
 0xb08   : > { %v1005_v33 = vmul.f32 %v2465_v31, %v997_v18 }
 0xb0a   : > { %v1010_v24 = vmul.f32 %v2020_v32, %v1005_v33 }
 0xb0c   : > { %v2843_v35 = vadd.f32 %v2021_v34, %v1010_v24 }
 0xb0e   : > { %2224 = vmatmul.mubr.msk.f32.vlgmr.msra.gmra.mrb[8].mxu1 %vm239_vm0, %v2843_v35 }
 0xb0f   : > { %2228 = vmatprep.mubr.msk.f32.mxu1 %vm2547_vm1, %v2548_v14 }
 0xbe1   : > { %v1115_v37 = vpop.f32.mrb[8].mxu1 }
 0xbe2   : > { %v1116_v39 = vadd.f32 %v2046_v36, %v1115_v37  ;;  %v2225_v40 = vpop.f32.mrb[9].mxu1  ;;  %v2026_v37 = vld [vmem:[%s3051_s2 + $0xc8] sm:$0xff] }
 0xbe4   : > { %1287 = vrot.lane.b32.xlu1 %v1116_v39, %s2551_s11  ;;  %1120 = vrot.lane.b32.xlu0 %v1116_v39, %s2550_s10  ;;  %s1921_s10 = scalar_lea.sflag [#allocation3], %s224_s7  ;;  %s2482_s11 = scalar_lea.vmem %s3009_s23, 16 }
 0xbe5   : > { %p2483_p11 = scmp.ne.s32.totalorder %s3009_s23, %s2482_s11 }
 0xbe7   : > { %p2484_p12 = pnand %p2483_p11, %p2625_p5 }
 0xbe8   : > { %1285 = vrot.lane.b32.xlu1 %v1116_v39, %s2549_s9  ;;  %s3007_s9 = scalar_lea.hbm %s3054_s5, %s2066_s13 }
 0xbe9   : > { %p2485_p13 = pneg %p2484_p12 }
 0xc56   : > { %v1288_v41 = vpop.permute.xlu1 %1287  ;;  %v1121_v42 = vpop.permute.xlu0 %1120 }
 0xc57   : > { %2227 = vmatpush3.xpose.msk.msra.mxu1 %vm368_vm2, %v1121_v42  ;;  %2237 = vmatpush3.xpose.msk.msra.mxu0 %vm368_vm2, %v1288_v41  ;;  %v2029_v41 = vld [vmem:[%s3051_s2 + $0xf8] sm:$0xff] }
 0xc58   : > { %2231 = vmatprep.subr.mxu1 %v2548_v14  ;;  %2345 = vmatprep.subr.bf16.mxu0 %v2546_v10 }
 0xc5a   : > { %v1286_v43 = vpop.permute.xlu1 %1285  ;;  %2229 = vmatmul.mubr.msk.f32.vlgmr.msra.gmra.mrb[10].mxu1 %vm368_vm2, %v1116_v39 }
 0xc5b   : > { %2239 = vmatmul.mubr.msk.f32.vlgmr.msra.gmra.mrb[8].mxu0 %vm368_vm2, %v1286_v43  ;;  %2233 = vmatprep.mubr.msk.f32.mxu1 %vm2547_vm1, %v2548_v14 }
 0xc5c   : > { %2254 = vmatprep.mubr.msk.f32.mxu0 %vm2547_vm1, %v2548_v14 }
 0xd2d   : > { %v1192_v44 = vpop.f32.mrb[10].mxu1 }
 0xd2e   : > { %v1196_v45 = vmul.f32 0.25, %v1192_v44  ;;  %v2230_v46 = vpop.f32.mrb[11].mxu1  ;;  %v1359_v47 = vpop.f32.mrb[8].mxu0 }
 0xd2f   : > { %v1363_v48 = vmul.f32 0.25, %v1359_v47  ;;  %v2240_v49 = vpop.f32.mrb[9].mxu0  ;;  %v2056_v47 = vld [vmem:[%s3052_s3 + $0xa] ss:$0 sm:$0xff] }
 0xd30   : > { %v1197_v50 = vadd.f32 %v1196_v45, %v2711_v38  ;;  %v2057_v49 = vld [vmem:[%s3052_s3 + $0xb] ss:$0 sm:$0xff] }
 0xd31   : > { %v1364_v51 = vadd.f32 %v1363_v48, %v2711_v38 }
 0xd32   : > { %v1198_v52 = vsel %vm451_vm3, %v1197_v50, -inf }
 0xd33   : > { %1199 = vmax.xlane.f32.xlu0 %v1198_v52  ;;  %v1365_v53 = vsel %vm451_vm3, %v1364_v51, -inf  ;;  %v2030_v52 = vld [vmem:[%s3051_s2 + $0x100] sm:$0xff] }
 0xd34   : > { %1366 = vmax.xlane.f32.xlu1 %v1365_v53  ;;  %v2031_v53 = vld [vmem:[%s3051_s2 + $0x110] sm:$0xff] }
 0xd45   : > { %1209 = vrot.lane.b32.xlu1 %v1116_v39, %s2553_s15 }
 0xd49   : > { %2441 = vrot.lane.b32.xlu1 %v2440_v0, %s2554_s16 }
 0xd4d   : > { %2446 = vrot.lane.b32.xlu1 %v2445_v1, %s2554_s16 }
 0xdc0   : > { %v1200_v54 = vpop.xlane.xlu0 %1199 }
 0xdc1   : > { %v1201_v55 = vsub.f32 %v1197_v50, %v1200_v54  ;;  %v1367_v56 = vpop.xlane.xlu1 %1366  ;;  %v2358_v54 = vpack.c.bf16 %v2031_v53, %v2030_v52 }
 0xdc2   : > { %v1368_v57 = vsub.f32 %v1364_v51, %v1367_v56  ;;  %v2033_v56 = vld [vmem:[%s3051_s2 + $0x130] sm:$0xff] }
 0xdc3   : > { %v1202_v58 = vmul.f32 1.442695, %v1201_v55  ;;  %v2032_v55 = vld [vmem:[%s3051_s2 + $0x120] sm:$0xff] }
 0xdc4   : > { %v1369_v59 = vmul.f32 1.442695, %v1368_v57  ;;  %v2361_v57 = vpack.c.bf16 %v2033_v56, %v2032_v55 }
 0xdc5   : > { %2466 = vpow2.f32 %v1202_v58  ;;  %v1210_v60 = vpop.permute.xlu1 %1209  ;;  %v2034_v58 = vld [vmem:[%s3051_s2 + $0x140] sm:$0xff] }
 0xdc6   : > { %2232 = vmatpush3.msra.mxu1 %v1210_v60  ;;  %2468 = vpow2.f32 %v1369_v59  ;;  %v2035_v59 = vld [vmem:[%s3051_s2 + $0x150] sm:$0xff] }
 0xdc7   : > { %2241 = vmatprep.subr.mxu1 %v2548_v14  ;;  %v2364_v60 = vpack.c.bf16 %v2035_v59, %v2034_v58 }
 0xdc9   : > { %v2442_v9 = vpop.permute.xlu1 %2441 }
 0xdca   : > { %v2444_v11 = vunpack.i.h.bf16 %v2442_v9  ;;  %v2443_v12 = vunpack.i.l.bf16 %v2442_v9 }
 0xdcc   : > { %v2346_v13 = vpack.c.bf16 %v2444_v11, %v2443_v12 }
 0xdcd   : > { %v2447_v15 = vpop.permute.xlu1 %2446 }
 0xdce   : > { %v2449_v16 = vunpack.i.h.bf16 %v2447_v15  ;;  %v2448_v17 = vunpack.i.l.bf16 %v2447_v15  ;;  %2347 = vmatpush3.bf16.msra.mxu0 %v2346_v13  ;;  %v2060_v13 = vld [vmem:[%s3052_s3 + $0xd] ss:$0 sm:$0xff] }
 0xdcf   : > { %v2467_v38 = vpop.eup %2466  ;;  %2348 = vmatprep.subr.bf16.mxu0 %v2546_v10 }
 0xdd0   : > { %v1204_v61 = vsel %vm451_vm3, %v2467_v38, 0.0  ;;  %v2469_v62 = vpop.eup %2468  ;;  %v2349_v18 = vpack.c.bf16 %v2449_v16, %v2448_v17 }
 0xdd1   : > { %1205 = vadd.xlane.f32.xlu0 %v1204_v61  ;;  %v1371_v63 = vsel %vm451_vm3, %v2469_v62, 0.0  ;;  %v2037_v61 = vld [vmem:[%s3051_s2 + $0x170] sm:$0xff] }
 0xdd2   : > { %2350 = vmatpush3.bf16.msra.mxu0 %v2349_v18 }
 0xdd3   : > { %2357 = vmatprep.subr.bf16.mxu0 %v2546_v10 }
 0xdd5   : > { %1372 = vadd.xlane.f32.xlu0 %v1371_v63  ;;  %v2058_v63 = vld [vmem:[%s3052_s3 + $0xc] ss:$0 sm:$0xff] }
 0xdeb   : > { %1376 = vrot.lane.b32.xlu0 %v1116_v39, %s2552_s30  ;;  %v2027_v39 = vld [vmem:[%s3051_s2 + $0xd8] sm:$0xff]  ;;  %s2486_s30 = sshll.u32 %s2556_s22, 4  ;;  %s2487_s30 = int_to_ptr.vmem [resolvable:$false] %s2486_s30 }
 0xdec   : > { %v2352_v40 = vpack.c.bf16 %v2027_v39, %v2026_v37  ;;  %v2063_v39 = vld [vmem:[%s3052_s3 + $0xf] ss:$0 sm:$0xff]  ;;  %s2488_s15 = scalar_lea.vmem %s2487_s30, 32  ;;  %p2489_p0 = scmp.lt.s32.totalorder %s3009_s23, %s2487_s30 }
 0xded   : > { %p2490_p1 = scmp.lt.s32.totalorder %s2488_s15, %s2482_s11 }
 0xdef   : > { %p2491_p2 = por %p2490_p1, %p2489_p0 }
 0xdf1   : > { %p2492_p3 = pnand %p2491_p2, %p2485_p13 }
 0xe5e   : > { %v1206_v2 = vpop.xlane.xlu0 %1205 }
 0xe5f   : > { %2470 = vrcp.f32 %v1206_v2 }
 0xe62   : > { %v1373_v3 = vpop.xlane.xlu0 %1372 }
 0xe63   : > { %2472 = vrcp.f32 %v1373_v3 }
 0xe66   : > { %v1377_v6 = vpop.permute.xlu0 %1376 }
 0xe69   : > { %v2471_v4 = vpop.eup %2470 }
 0xe6a   : > { %v1208_v5 = vmul.f32 %v2471_v4, %v2467_v38  ;;  %v2036_v38 = vld [vmem:[%s3051_s2 + $0x160] sm:$0xff] }
 0xe6c   : > { %2234 = vmatmul.mubr.msk.f32.vlgmr.msra.gmra.mrb[12].mxu1 %vm451_vm3, %v1208_v5 }
 0xe6d   : > { %v2473_v7 = vpop.eup %2472  ;;  %2242 = vmatpush3.msra.mxu1 %v1377_v6  ;;  %2243 = vmatprep.mubr.msk.f32.mxu1 %vm2547_vm1, %v2548_v14 }
 0xe6e   : > { %v1375_v8 = vmul.f32 %v2473_v7, %v2469_v62  ;;  %2351 = vmatprep.subr.bf16.mxu1 %v2546_v10  ;;  %v2367_v62 = vpack.c.bf16 %v2037_v61, %v2036_v38 }
 0xe70   : > { %2244 = vmatmul.mubr.msk.f32.vlgmr.msra.gmra.mrb[14].mxu1 %vm451_vm3, %v1375_v8 }
 0xe71   : > { %2265 = vmatprep.mubr.msk.f32.mxu1 %vm2547_vm1, %v2548_v14  ;;  %2353 = vmatpush3.bf16.msra.mxu1 %v2352_v40 }
 0xe72   : > { %2354 = vmatprep.subr.bf16.mxu1 %v2546_v10 }
 0xf3f   : > { %v1281_v19 = vpop.f32.mrb[12].mxu1 }
 0xf40   : > { %v2235_v20 = vpop.f32.mrb[13].mxu1 }
 0xf43   : > { %v1448_v21 = vpop.f32.mrb[14].mxu1 }
 0xf44   : > { %1453 = vrot.lane.b32.xlu0 %v1448_v21, %s2555_s17  ;;  %v2245_v22 = vpop.f32.mrb[15].mxu1 }
 0xfb6   : > { %v1454_v23 = vpop.permute.xlu0 %1453 }
 0xfb7   : > { %v1456_v25 = vsel %vm368_vm2, %v1281_v19, %v1454_v23 }
 0xfb8   : > { %2255 = vmatmul.mubr.msk.f32.vlgmr.msra.gmra.mrb[10].mxu0 %vm239_vm0, %v1456_v25 }
 0xfb9   : > { %2284 = vmatprep.mubr.msk.f32.mxu0 %vm2547_vm1, %v2548_v14  ;;  %2359 = vmatpush3.bf16.msra.mxu0 %v2358_v54 }
 0xfba   : > { %2360 = vmatprep.subr.bf16.mxu0 %v2546_v10 }
 0xfbd   : > { %2362 = vmatpush3.bf16.msra.mxu0 %v2361_v57 }
 0xfbe   : > { %2363 = vmatprep.subr.bf16.mxu0 %v2546_v10 }
 0xfc1   : > { %2365 = vmatpush3.bf16.msra.mxu0 %v2364_v60 }
 0xfc2   : > { %2366 = vmatprep.subr.bf16.mxu0 %v2546_v10 }
 0xfc5   : > { %2368 = vmatpush3.bf16.msra.mxu0 %v2367_v62 }
0x108b   : > { %v1546_v27 = vpop.f32.mrb[10].mxu0 }
0x108c   : > { %v1547_v28 = vadd.f32 %v2054_v26, %v1546_v27  ;;  %v2256_v29 = vpop.f32.mrb[11].mxu0  ;;  %v1761_v26 = vld [vmem:[%s3053_s4] sm:$0xff]  ;;  %v1762_v27 = vld [vmem:[%s3053_s4 + $0x8] sm:$0xff] }
0x108d   : > { %v1763_v29 = vld [vmem:[%s3053_s4 + $0x10] sm:$0xff] }
0x108e   : > { %v1550_v30 = vadd.f32 %v1547_v28, %v2843_v35  ;;  %v2028_v35 = vld [vmem:[%s3051_s2 + $0xe8] sm:$0xff]  ;;  %v2370_v28 = vpack.c.bf16 %v1762_v27, %v1761_v26 }
0x108f   : > { %v2355_v42 = vpack.c.bf16 %v2029_v41, %v2028_v35  ;;  %v1766_v41 = vld [vmem:[%s3053_s4 + $0x20] sm:$0xff] }
0x1090   : > { %v1551_v31 = vsel %vm239_vm0, %v1550_v30, 0.0 }
0x1091   : > { %1552 = vadd.xlane.f32.xlu1 %v1551_v31  ;;  %2356 = vmatpush3.bf16.msra.mxu1 %v2355_v42  ;;  %v1767_v42 = vld [vmem:[%s3053_s4 + $0x28] sm:$0xff] }
0x1092   : > { %2369 = vmatprep.subr.bf16.mxu1 %v2546_v10 }
0x111e   : > { %v1553_v32 = vpop.xlane.xlu1 %1552 }
0x111f   : > { %v1554_v33 = vmul.f32 0.03125, %v1553_v32 }
0x1121   : > { %v1555_v34 = vsub.f32 %v1550_v30, %v1554_v33  ;;  %v1764_v30 = vld [vmem:[%s3053_s4 + $0x18] sm:$0xff] }
0x1122   : > { %v2373_v31 = vpack.c.bf16 %v1764_v30, %v1763_v29 }
0x1123   : > { %v1556_v24 = vmul.f32 %v1555_v34, %v1555_v34 }
0x1125   : > { %v1557_v36 = vsel %vm239_vm0, %v1556_v24, 0.0 }
0x1126   : > { %1558 = vadd.xlane.f32.xlu0 %v1557_v36  ;;  %v2062_v36 = vld [vmem:[%s3052_s3 + $0xe] ss:$0 sm:$0xff] }
0x11b3   : > { %v1559_v43 = vpop.xlane.xlu0 %1558 }
0x11b4   : > { %v1560_v44 = vmul.f32 0.03125, %v1559_v43  ;;  %v1768_v43 = vld [vmem:[%s3053_s4 + $0x30] sm:$0xff] }
0x11b6   : > { %v1561_v45 = vadd.f32 1e-12, %v1560_v44  ;;  %v2376_v44 = vpack.c.bf16 %v1767_v42, %v1766_v41 }
0x11b8   : > { %2474 = vrsqrt.f32 %v1561_v45  ;;  %v1769_v45 = vld [vmem:[%s3053_s4 + $0x38] sm:$0xff] }
0x11c2   : > { %v2475_v46 = vpop.eup %2474 }
0x11c3   : > { %v1563_v48 = vmul.f32 %v2475_v46, %v1555_v34  ;;  %v1765_v46 = vld [vmem:[%s3053_s4 + $0x42] sm:$0x1] }
0x11c5   : > { %v1568_v50 = vmul.f32 %v2056_v47, %v1563_v48 }
0x11c7   : > { %v1573_v51 = vadd.f32 %v2057_v49, %v1568_v50 }
0x11c9   : > { %2266 = vmatmul.mubr.msk.f32.vlgmr.msra.gmra.mrb[16].mxu1 %vm239_vm0, %v1573_v51 }
0x11ca   : > { %2295 = vmatprep.mubr.msk.f32.mxu1 %vm2547_vm1, %v2548_v14  ;;  %2371 = vmatpush3.bf16.msra.mxu1 %v2370_v28 }
0x11cb   : > { %2372 = vmatprep.subr.bf16.mxu1 %v2546_v10 }
0x11ce   : > { %2374 = vmatpush3.bf16.msra.mxu1 %v2373_v31 }
0x11cf   : > { %2375 = vmatprep.subr.bf16.mxu1 %v2546_v10 }
0x129c   : > { %v1647_v0 = vpop.f32.mrb[16].mxu1 }
0x129d   : > { %v1648_v1 = vadd.f32 %v2058_v63, %v1647_v0  ;;  %v2267_v2 = vpop.f32.mrb[17].mxu1 }
0x129f   : > { %v1652_v3 = vmul.f32 0.044715, %v1648_v1  ;;  %v1651_v9 = vmul.f32 0.5, %v1648_v1 }
0x12a1   : > { %v1653_v4 = vmul.f32 %v1652_v3, %v1648_v1 }
0x12a3   : > { %v1654_v5 = vmul.f32 %v1653_v4, %v1648_v1 }
0x12a5   : > { %v1655_v6 = vadd.f32 %v1654_v5, %v1648_v1 }
0x12a7   : > { %v1656_v7 = vmul.f32 0.7978846, %v1655_v6 }
0x12a9   : > { %2476 = vtanh.f32 %v1656_v7 }
0x12b3   : > { %v2477_v8 = vpop.eup %2476 }
0x12b4   : > { %v1658_v11 = vadd.f32 1.0, %v2477_v8 }
0x12b6   : > { %v1659_v12 = vmul.f32 %v1658_v11, %v1651_v9 }
0x12b8   : > { %2285 = vmatmul.mubr.msk.f32.vlgmr.msra.gmra.mrb[12].mxu0 %vm918_vm4, %v1659_v12 }
0x138b   : > { %v1733_v15 = vpop.f32.mrb[12].mxu0 }
0x138c   : > { %v1734_v16 = vadd.f32 %v2060_v13, %v1733_v15  ;;  %v2286_v17 = vpop.f32.mrb[13].mxu0 }
0x138e   : > { %v1737_v18 = vadd.f32 %v1734_v16, %v1573_v51  ;;  %v1770_v51 = vld [vmem:[%s3053_s4 + $0x43] sm:$0x1] }
0x1390   : > { %v1738_v19 = vsel %vm239_vm0, %v1737_v18, 0.0 }
0x1391   : > { %1739 = vadd.xlane.f32.xlu0 %v1738_v19 }
0x141e   : > { %v1740_v20 = vpop.xlane.xlu0 %1739 }
0x141f   : > { %v1741_v21 = vmul.f32 0.03125, %v1740_v20 }
0x1421   : > { %v1742_v22 = vsub.f32 %v1737_v18, %v1741_v21 }
0x1423   : > { %v1743_v23 = vmul.f32 %v1742_v22, %v1742_v22 }
0x1425   : > { %v1744_v25 = vsel %vm239_vm0, %v1743_v23, 0.0 }
0x1426   : > { %1745 = vadd.xlane.f32.xlu1 %v1744_v25 }
0x14b3   : > { %v1746_v32 = vpop.xlane.xlu1 %1745 }
0x14b4   : > { %v1747_v33 = vmul.f32 0.03125, %v1746_v32 }
0x14b6   : > { %v1748_v34 = vadd.f32 1e-12, %v1747_v33 }
0x14b8   : > { %2478 = vrsqrt.f32 %v1748_v34 }
0x14c2   : > { %v2479_v24 = vpop.eup %2478 }
0x14c3   : > { %v1750_v37 = vmul.f32 %v2479_v24, %v1742_v22 }
0x14c5   : > { %v1755_v40 = vmul.f32 %v2062_v36, %v1750_v37 }
0x14c7   : > { %v1760_v35 = vadd.f32 %v2063_v39, %v1755_v40 }
0x14c9   : > { %2296 = vmatmul.mubr.msk.f32.vlgmr.msra.gmra.mrb[18].mxu1 %vm239_vm0, %v1760_v35 }
0x14ca   : > { %2306 = vmatprep.mubr.msk.f32.mxu1 %vm2547_vm1, %v2548_v14  ;;  %2377 = vmatpush3.bf16.msra.mxu1 %v2376_v44  ;;  %v2379_v14 = vpack.c.bf16 %v1769_v45, %v1768_v43 }
0x14cb   : > { %2378 = vmatprep.subr.bf16.mxu1 %v2546_v10 }
0x14ce   : > { %2380 = vmatpush3.bf16.msra.mxu1 %v2379_v14 }
0x159c   : > { %v1840_v47 = vpop.f32.mrb[18].mxu1 }
0x159d   : > { %v1841_v48 = vadd.f32 %v1840_v47, %v1765_v46  ;;  %v2297_v49 = vpop.f32.mrb[19].mxu1 }
0x159f   : > { %2480 = vtanh.f32 %v1841_v48 }
0x15a9   : > { %v2481_v50 = vpop.eup %2480 }
0x15aa   : > { %2307 = vmatmul.mubr.msk.f32.vlgmr.msra.gmra.mrb[20].mxu1 %vm239_vm0, %v2481_v50 }
0x167d   : > { %v1914_v10 = vpop.f32.mrb[20].mxu1 }
0x167e   : > { %v1915_v52 = vadd.f32 %v1914_v10, %v1770_v51  ;;  %v2308_v53 = vpop.f32.mrb[21].mxu1 }
0x1680   : > { %1919 = vst.msk [vmem:[%s225_s14] sm:$0x1] %vm1918_vm5, %v1915_v52 }
0x1681   : > { %2495 = shalt.err (!%p2492_p3)
}
0x1682   : > { %s2496_s16 = scalar_lea.hbm %s3007_s9, 16  ;;  %s2500_s7 = scalar_lea.hbm %s3054_s5, 32 }
0x1683   : > { %p2497_p4 = scmp.ne.s32.totalorder %s3007_s9, %s2496_s16  ;;  %p2501_p9 = scmp.lt.u32.totalorder %s3007_s9, %s3054_s5 }
0x1684   : > { %p2502_p10 = scmp.lt.u32.totalorder %s2500_s7, %s2496_s16  ;;  %p2504_p12 = scmp.lt.u32.totalorder %s2496_s16, %s3007_s9 }
0x1685   : > { %p2498_p7 = pnand %p2497_p4, %p2625_p5 }
0x1686   : > { %p2503_p11 = por %p2502_p10, %p2501_p9 }
0x1687   : > { %p2499_p8 = pneg %p2498_p7 }
0x1688   : > { %p2505_p13 = por %p2504_p12, %p2503_p11 }
0x168a   : > { %p2506_p0 = pnand %p2505_p13, %p2499_p8 }
0x168c   : > { %2509 = shalt.err (!%p2506_p0)
}
0x168d   : > { %2381 = dma.vmem_to_hbm [thread:$0]  (%p2625_p5), %s3009_s23, 16, %s3007_s9, %s1921_s10  }
0x168e PF: > { %p2387_p1 = scmp.ge.s32.totalorder %s2544_s21, 2  ;;  %s1945_s13 = sand.u32 1, %s2532_s18  }
0x168f   : > { %s1946_s14 = scalar_lea.sflag [#allocation3], %s1945_s13 }
0x1690   : > { %p2384_p2 = pnand %p2387_p1, %p2629_p6 }
0x1692   : > { %2527 = dma.done.wait (!%p2384_p2), %s1946_s14, 16  }
0x1693   : > { %2529 = vsyncadd (!%p2384_p2), %s1946_s14, 4294967280  ;;  %p15_p3 = scmp.ge.s32.totalorder %s2612_s24, 4   ;;  %s3057_s18 = smov %s2536_s19 }
0x1694   : > { %s3058_s19 = smov %s2540_s20  ;;  %s3059_s20 = smov %s2623_s27 }
0x1695   : > { %s3060_s21 = smov %s2612_s24  ;;  %17 = sbr.rel (!%p15_p3) target bundleno = 3 (0x3), region = 80 }
0x169c   :  { %1950 = vsyncpa [#allocation3], 1 }
0x169d   :  { %1952 = vsyncpa [#allocation3 + $0x1], 1 }

</bundles_post_ra>
